<compile_context>
chip_gen: v7x
topology: tpu7x:2x2x1
jax: 0.10.0
libtpu: 0.0.40
codegen_flags: <defaults>
</compile_context>

<pallas_src>
from functools import partial

import jax
import jax.numpy as jnp
import numpy as np
from jax.experimental import pallas as pl
from jax.experimental.pallas import tpu as pltpu

HIDDEN = 200   # nn.Linear(1, 200)


def lambda_kernel(tau_ref, t_ref, w1b1_ref, w2_ref, b2_ref,
                  ep_ref, sl_ref, lo_ref, hi_ref, out_ref):
    # --- normalized time, lane-major -----------------------------------------
    inv_tau = 1.0 / tau_ref[0]                        # scalar (SMEM)
    t = t_ref[...] * inv_tau                          # (1, TN)

    # --- fc1 + sigmoid with the affine folded into the weights ---------------
    # sigmoid(w1*x + b1) = 0.5 + 0.5*tanh(0.5*w1*x + 0.5*b1); the 0.5/+0.5 are
    # folded into w2h / b2h in the wrapper, so only a single tanh pass remains.
    w1h = w1b1_ref[:, 0:1]                            # (H, 1)
    b1h = w1b1_ref[:, 1:2]                            # (H, 1)
    h = jnp.tanh(w1h * t + b1h)                       # (H, TN) broadcast outer product

    # Row selector for building (2,1) per-channel columns from SMEM scalars.
    row_is_0 = jax.lax.broadcasted_iota(jnp.int32, (2, 1), 0) == 0

    def col2(a, b):                                   # (2, 1) column [a; b]
        return jnp.where(row_is_0, a, b)

    # --- fc2 on the MXU: (2, H) @ (H, TN) -> (2, TN) --------------------------
    b2col = col2(b2_ref[0], b2_ref[1])                # (2, 1) folded fc2 bias
    scaling = jnp.dot(w2_ref[...], h,
                      preferred_element_type=jnp.float32) + b2col      # (2, TN)

    # --- polynomial envelope vanishing at the segment endpoints ---------------
    poly = (t * (t - 0.25) * (t - 0.5) * (t - 0.75) * (t - 1.0)) * 10.0  # (1, TN)
    scaling = scaling * poly                                             # (2, TN)

    # --- piecewise-linear protocol, both channels at once ---------------------
    offs = (0.0, 0.25, 0.5, 0.75)
    acc = jnp.zeros_like(scaling)                     # (2, TN)
    for i in range(4):                                # 4 protocol segments
        ep = col2(ep_ref[2 * i], ep_ref[2 * i + 1])   # (2, 1) SMEM scalar columns
        sl = col2(sl_ref[2 * i], sl_ref[2 * i + 1])
        lo = col2(lo_ref[2 * i], lo_ref[2 * i + 1])
        hi = col2(hi_ref[2 * i], hi_ref[2 * i + 1])
        seg = jnp.clip(scaling + ep + (t - offs[i]) * sl, lo, hi)       # (2, TN)
        if i == 0:
            mask = t < 0.25
        elif i == 3:
            mask = (0.75 <= t) & (t <= 1.0)
        else:
            mask = (offs[i] <= t) & (t < offs[i] + 0.25)
        acc = acc + jnp.where(mask, seg, 0.0)         # (1,TN) mask broadcasts
    out_ref[...] = acc                                # single lane-dense (2, TN) store


def _num_grid_blocks():
    """1 step on single-TC chips (v5e/v6e); 2 parallel steps on 2-TC v7x."""
    try:
        kind = jax.devices()[0].device_kind.lower()
    except Exception:
        return 1
    return 2 if ("v7" in kind or "7x" in kind) else 1


@partial(jax.jit, static_argnames=("num_blocks",))
def _lambda_forward_impl(t, tau, w1, b1, w2, b2, ep4, slopes, clamp_lo, clamp_hi,
                         *, num_blocks):
    n = t.shape[0]
    # Lane tile: cover n in `num_blocks` steps, rounded up to a multiple of 128.
    tn = max(128, pl.cdiv(pl.cdiv(n, num_blocks), 128) * 128)
    n_pad = tn * num_blocks

    # Fold the sigmoid affine into the (tiny) weights once, outside the kernel.
    w1h = 0.5 * w1                                     # (H, 1)
    b1h = (0.5 * b1).reshape(HIDDEN, 1)                # (H, 1)
    w2h = 0.5 * w2                                     # (2, H)
    b2h = b2 + 0.5 * jnp.sum(w2, axis=1)               # (2,)
    w1b1 = jnp.concatenate([w1h, b1h], axis=1)         # (H, 2) packed constant tile

    # Lane-major time vector, zero-padded (padded samples sliced off afterwards).
    t_lane = jnp.pad(t[:, 0], (0, n_pad - n)).reshape(1, n_pad)

    # Flatten segment params row-major: element [2*i + c] = (segment i, channel c).
    ep_flat = ep4.reshape(-1)
    sl_flat = slopes.reshape(-1)
    lo_flat = clamp_lo.reshape(-1)
    hi_flat = clamp_hi.reshape(-1)

    rep = lambda i: (0, 0)   # constant tiles: same block every step
    out_t = pl.pallas_call(
        lambda_kernel,
        out_shape=jax.ShapeDtypeStruct((2, n_pad), jnp.float32),
        grid_spec=pltpu.PrefetchScalarGridSpec(
            num_scalar_prefetch=0,
            grid=(num_blocks,),
            in_specs=[
                pl.BlockSpec(memory_space=pltpu.SMEM),        # tau (1,)
                pl.BlockSpec((1, tn), lambda i: (0, i)),      # t, lane-major
                pl.BlockSpec((HIDDEN, 2), rep),               # [w1h | b1h]
                pl.BlockSpec((2, HIDDEN), rep),               # w2h
                pl.BlockSpec(memory_space=pltpu.SMEM),        # b2h        (2,)
                pl.BlockSpec(memory_space=pltpu.SMEM),        # end points (8,)
                pl.BlockSpec(memory_space=pltpu.SMEM),        # slopes     (8,)
                pl.BlockSpec(memory_space=pltpu.SMEM),        # clamp lo   (8,)
                pl.BlockSpec(memory_space=pltpu.SMEM),        # clamp hi   (8,)
            ],
            out_specs=pl.BlockSpec((2, tn), lambda i: (0, i)),
        ),
        compiler_params=pltpu.CompilerParams(
            dimension_semantics=("parallel",)),               # megacore split on v7x
    )(tau, t_lane, w1b1, w2h, b2h, ep_flat, sl_flat, lo_flat, hi_flat)

    return out_t[:, :n].T     # (N, 2)


def lambda_forward(t, tau, w1, b1, w2, b2, ep4, slopes, clamp_lo, clamp_hi):
    """t: (N, 1); weights in torch-native layout:
       w1 (HIDDEN, 1), b1 (HIDDEN,), w2 (2, HIDDEN), b2 (2,).
       Segment params ep4/slopes/clamp_lo/clamp_hi: (4, 2). Returns (N, 2)."""
    return _lambda_forward_impl(t, tau, w1, b1, w2, b2, ep4, slopes,
                                clamp_lo, clamp_hi, num_blocks=_num_grid_blocks())


def lambda_reference(t, tau, w1, b1, w2, b2, ep4, slopes, clamp_lo, clamp_hi):
    """Pure-JAX reference mirroring the PyTorch forward (full-precision matmuls)."""
    tn = t / tau[0]                                                        # (N, 1)
    h = jax.nn.sigmoid(
        jnp.dot(tn, w1.T, precision=jax.lax.Precision.HIGHEST) + b1)       # (N, H)
    scaling = jnp.dot(h, w2.T, precision=jax.lax.Precision.HIGHEST) + b2   # (N, 2)
    scaling = scaling * (tn * (tn - 0.25) * (tn - 0.5) * (tn - 0.75) * (tn - 1.0)) * 10.0
    out = jnp.zeros_like(scaling)
    offs = (0.0, 0.25, 0.5, 0.75)
    for i in range(4):
        seg = jnp.clip(scaling + ep4[i] + (tn - offs[i]) * slopes[i],
                       clamp_lo[i], clamp_hi[i])
        if i == 0:
            mask = tn < 0.25
        elif i == 3:
            mask = (0.75 <= tn) & (tn <= 1.0)
        else:
            mask = (offs[i] <= tn) & (tn < offs[i] + 0.25)
        out = out + mask.astype(seg.dtype) * seg
    return out


if __name__ == "__main__":
    key = jax.random.PRNGKey(0)
    k1, k2, k3, k4, kt = jax.random.split(key, 5)

    # PyTorch nn.Linear default init: U(-1/sqrt(fan_in), 1/sqrt(fan_in)).
    bound1 = 1.0 / np.sqrt(1.0)
    w1 = jax.random.uniform(k1, (HIDDEN, 1), jnp.float32, -bound1, bound1)   # fc1.weight
    b1 = jax.random.uniform(k2, (HIDDEN,), jnp.float32, -bound1, bound1)     # fc1.bias
    bound2 = 1.0 / np.sqrt(HIDDEN)
    w2 = jax.random.uniform(k3, (2, HIDDEN), jnp.float32, -bound2, bound2)   # fc2.weight
    b2 = jax.random.uniform(k4, (2,), jnp.float32, -bound2, bound2)          # fc2.bias

    # Protocol buffers (num_steps = 4; last point equals first).
    tau_val = 2.0
    end_point_protocol = jnp.array(
        [[1.0, 0.5],
         [2.0, 1.5],
         [1.5, 2.0],
         [0.5, 1.0],
         [1.0, 0.5]], dtype=jnp.float32)                                 # (5, 2)
    num_steps = end_point_protocol.shape[0] - 1
    protocol_slopes = jnp.diff(end_point_protocol, axis=0) * num_steps   # (4, 2)
    clamp_lo = jnp.minimum(end_point_protocol[:-1], end_point_protocol[1:])  # (4, 2)
    clamp_hi = jnp.maximum(end_point_protocol[:-1], end_point_protocol[1:])  # (4, 2)
    ep4 = end_point_protocol[:4]                                         # (4, 2)
    tau = jnp.array([tau_val], dtype=jnp.float32)

    # Example input: t of shape (N, 1) in [0, tau]; N deliberately not a
    # multiple of 128 to exercise the padding path.
    N = 1000
    t = jax.random.uniform(kt, (N, 1), jnp.float32, 0.0, tau_val)

    out = lambda_forward(t, tau, w1, b1, w2, b2, ep4, protocol_slopes, clamp_lo, clamp_hi)
    out = jax.block_until_ready(out)

    ref = lambda_reference(t, tau, w1, b1, w2, b2, ep4, protocol_slopes, clamp_lo, clamp_hi)
    np.testing.assert_allclose(np.asarray(out), np.asarray(ref), rtol=1e-4, atol=1e-4)

    print("KERNEL_OK")
</pallas_src>

<mosaic_0001>
module attributes {stable_mosaic.version = 11 : i64} {
  func.func @lambda_kernel(%arg0: i32, %arg1: memref<1xf32, #tpu.memory_space<smem>>, %arg2: memref<1x1024xf32, #tpu.memory_space<vmem>>, %arg3: memref<200x2xf32, #tpu.memory_space<vmem>>, %arg4: memref<2x200xf32, #tpu.memory_space<vmem>>, %arg5: memref<2xf32, #tpu.memory_space<smem>>, %arg6: memref<8xf32, #tpu.memory_space<smem>>, %arg7: memref<8xf32, #tpu.memory_space<smem>>, %arg8: memref<8xf32, #tpu.memory_space<smem>>, %arg9: memref<8xf32, #tpu.memory_space<smem>>, %arg10: memref<2x1024xf32, #tpu.memory_space<vmem>>) attributes {dimension_semantics = [#tpu.dimension_semantics<parallel>], iteration_bounds = array<i64: 1>, scalar_prefetch = 0 : i64, scratch_operands = 0 : i64, tpu.core_type = #tpu.core_type<tc>, window_params = [{transform_indices = @transform_0, window_bounds = array<i64: 1>}, {transform_indices = @transform_1, window_bounds = array<i64: 1, 1024>}, {pipeline_mode = #tpu.pipeline_mode<synchronous>, transform_indices = @transform_2, window_bounds = array<i64: 200, 2>}, {pipeline_mode = #tpu.pipeline_mode<synchronous>, transform_indices = @transform_3, window_bounds = array<i64: 2, 200>}, {transform_indices = @transform_4, window_bounds = array<i64: 2>}, {transform_indices = @transform_5, window_bounds = array<i64: 8>}, {transform_indices = @transform_6, window_bounds = array<i64: 8>}, {transform_indices = @transform_7, window_bounds = array<i64: 8>}, {transform_indices = @transform_8, window_bounds = array<i64: 8>}, {transform_indices = @transform_9, window_bounds = array<i64: 2, 1024>}]} {
    %c0 = arith.constant 0 : index
    %0 = memref.load %arg1[%c0] : memref<1xf32, #tpu.memory_space<smem>>
    %cst = arith.constant 1.000000e+00 : f32
    %1 = arith.divf %cst, %0 : f32
    %c0_0 = arith.constant 0 : index
    %c0_1 = arith.constant 0 : index
    %2 = vector.load %arg2[%c0_0, %c0_1] : memref<1x1024xf32, #tpu.memory_space<vmem>>, vector<1x1024xf32>
    %3 = vector.broadcast %1 : f32 to vector<1x1024xf32>
    %4 = arith.mulf %2, %3 : vector<1x1024xf32>
    %c0_2 = arith.constant 0 : index
    %c0_3 = arith.constant 0 : index
    %5 = vector.load %arg3[%c0_2, %c0_3] : memref<200x2xf32, #tpu.memory_space<vmem>>, vector<200x1xf32>
    %c0_4 = arith.constant 0 : index
    %c1 = arith.constant 1 : index
    %6 = vector.load %arg3[%c0_4, %c1] : memref<200x2xf32, #tpu.memory_space<vmem>>, vector<200x1xf32>
    %7 = vector.broadcast %5 : vector<200x1xf32> to vector<200x1024xf32>
    %8 = vector.broadcast %4 : vector<1x1024xf32> to vector<200x1024xf32>
    %9 = arith.mulf %7, %8 : vector<200x1024xf32>
    %10 = vector.broadcast %6 : vector<200x1xf32> to vector<200x1024xf32>
    %11 = arith.addf %9, %10 : vector<200x1024xf32>
    %12 = math.tanh %11 : vector<200x1024xf32>
    %13 = tpu.iota {dimensions = array<i32: 0>} : vector<2x1xi32>
    %c0_i32 = arith.constant 0 : i32
    %14 = vector.broadcast %c0_i32 : i32 to vector<2x1xi32>
    %15 = arith.cmpi eq, %13, %14 : vector<2x1xi32>
    %c0_5 = arith.constant 0 : index
    %16 = memref.load %arg5[%c0_5] : memref<2xf32, #tpu.memory_space<smem>>
    %c1_6 = arith.constant 1 : index
    %17 = memref.load %arg5[%c1_6] : memref<2xf32, #tpu.memory_space<smem>>
    %18 = vector.broadcast %16 : f32 to vector<2x1xf32>
    %19 = vector.broadcast %17 : f32 to vector<2x1xf32>
    %20 = arith.select %15, %18, %19 : vector<2x1xi1>, vector<2x1xf32>
    %c0_7 = arith.constant 0 : index
    %c0_8 = arith.constant 0 : index
    %21 = vector.load %arg4[%c0_7, %c0_8] : memref<2x200xf32, #tpu.memory_space<vmem>>, vector<2x200xf32>
    %cst_9 = arith.constant dense<0.000000e+00> : vector<2x1024xf32>
    %22 = tpu.matmul %21, %12, %cst_9 {dimension_numbers = #tpu.dot_dimension_numbers<[1], [0], [0], [1], [0, 0, 1, 1], [], []>} : vector<2x200xf32>, vector<200x1024xf32>, vector<2x1024xf32> -> vector<2x1024xf32>
    %23 = vector.broadcast %20 : vector<2x1xf32> to vector<2x1024xf32>
    %24 = arith.addf %22, %23 : vector<2x1024xf32>
    %cst_10 = arith.constant 2.500000e-01 : f32
    %25 = vector.broadcast %cst_10 : f32 to vector<1x1024xf32>
    %26 = arith.subf %4, %25 : vector<1x1024xf32>
    %27 = arith.mulf %4, %26 : vector<1x1024xf32>
    %cst_11 = arith.constant 5.000000e-01 : f32
    %28 = vector.broadcast %cst_11 : f32 to vector<1x1024xf32>
    %29 = arith.subf %4, %28 : vector<1x1024xf32>
    %30 = arith.mulf %27, %29 : vector<1x1024xf32>
    %cst_12 = arith.constant 7.500000e-01 : f32
    %31 = vector.broadcast %cst_12 : f32 to vector<1x1024xf32>
    %32 = arith.subf %4, %31 : vector<1x1024xf32>
    %33 = arith.mulf %30, %32 : vector<1x1024xf32>
    %cst_13 = arith.constant 1.000000e+00 : f32
    %34 = vector.broadcast %cst_13 : f32 to vector<1x1024xf32>
    %35 = arith.subf %4, %34 : vector<1x1024xf32>
    %36 = arith.mulf %33, %35 : vector<1x1024xf32>
    %cst_14 = arith.constant 1.000000e+01 : f32
    %37 = vector.broadcast %cst_14 : f32 to vector<1x1024xf32>
    %38 = arith.mulf %36, %37 : vector<1x1024xf32>
    %39 = vector.broadcast %38 : vector<1x1024xf32> to vector<2x1024xf32>
    %40 = arith.mulf %24, %39 : vector<2x1024xf32>
    %cst_15 = arith.constant 0.000000e+00 : f32
    %41 = vector.broadcast %cst_15 : f32 to vector<2x1024xf32>
    %c0_16 = arith.constant 0 : index
    %42 = memref.load %arg6[%c0_16] : memref<8xf32, #tpu.memory_space<smem>>
    %c1_17 = arith.constant 1 : index
    %43 = memref.load %arg6[%c1_17] : memref<8xf32, #tpu.memory_space<smem>>
    %44 = vector.broadcast %42 : f32 to vector<2x1xf32>
    %45 = vector.broadcast %43 : f32 to vector<2x1xf32>
    %46 = arith.select %15, %44, %45 : vector<2x1xi1>, vector<2x1xf32>
    %c0_18 = arith.constant 0 : index
    %47 = memref.load %arg7[%c0_18] : memref<8xf32, #tpu.memory_space<smem>>
    %c1_19 = arith.constant 1 : index
    %48 = memref.load %arg7[%c1_19] : memref<8xf32, #tpu.memory_space<smem>>
    %49 = vector.broadcast %47 : f32 to vector<2x1xf32>
    %50 = vector.broadcast %48 : f32 to vector<2x1xf32>
    %51 = arith.select %15, %49, %50 : vector<2x1xi1>, vector<2x1xf32>
    %c0_20 = arith.constant 0 : index
    %52 = memref.load %arg8[%c0_20] : memref<8xf32, #tpu.memory_space<smem>>
    %c1_21 = arith.constant 1 : index
    %53 = memref.load %arg8[%c1_21] : memref<8xf32, #tpu.memory_space<smem>>
    %54 = vector.broadcast %52 : f32 to vector<2x1xf32>
    %55 = vector.broadcast %53 : f32 to vector<2x1xf32>
    %56 = arith.select %15, %54, %55 : vector<2x1xi1>, vector<2x1xf32>
    %c0_22 = arith.constant 0 : index
    %57 = memref.load %arg9[%c0_22] : memref<8xf32, #tpu.memory_space<smem>>
    %c1_23 = arith.constant 1 : index
    %58 = memref.load %arg9[%c1_23] : memref<8xf32, #tpu.memory_space<smem>>
    %59 = vector.broadcast %57 : f32 to vector<2x1xf32>
    %60 = vector.broadcast %58 : f32 to vector<2x1xf32>
    %61 = arith.select %15, %59, %60 : vector<2x1xi1>, vector<2x1xf32>
    %62 = vector.broadcast %46 : vector<2x1xf32> to vector<2x1024xf32>
    %63 = arith.addf %40, %62 : vector<2x1024xf32>
    %cst_24 = arith.constant 0.000000e+00 : f32
    %64 = vector.broadcast %cst_24 : f32 to vector<1x1024xf32>
    %65 = arith.subf %4, %64 : vector<1x1024xf32>
    %66 = vector.broadcast %65 : vector<1x1024xf32> to vector<2x1024xf32>
    %67 = vector.broadcast %51 : vector<2x1xf32> to vector<2x1024xf32>
    %68 = arith.mulf %66, %67 : vector<2x1024xf32>
    %69 = arith.addf %63, %68 : vector<2x1024xf32>
    %70 = vector.broadcast %56 : vector<2x1xf32> to vector<2x1024xf32>
    %71 = arith.maximumf %70, %69 : vector<2x1024xf32>
    %72 = vector.broadcast %61 : vector<2x1xf32> to vector<2x1024xf32>
    %73 = arith.minimumf %72, %71 : vector<2x1024xf32>
    %cst_25 = arith.constant 2.500000e-01 : f32
    %74 = vector.broadcast %cst_25 : f32 to vector<1x1024xf32>
    %75 = arith.cmpf olt, %4, %74 : vector<1x1024xf32>
    %cst_26 = arith.constant 0.000000e+00 : f32
    %76 = vector.shape_cast %75 : vector<1x1024xi1> to vector<1x1024xi1>
    %77 = vector.broadcast %76 : vector<1x1024xi1> to vector<2x1024xi1>
    %78 = vector.broadcast %cst_26 : f32 to vector<2x1024xf32>
    %79 = arith.select %77, %73, %78 : vector<2x1024xi1>, vector<2x1024xf32>
    %80 = arith.addf %41, %79 : vector<2x1024xf32>
    %c2 = arith.constant 2 : index
    %81 = memref.load %arg6[%c2] : memref<8xf32, #tpu.memory_space<smem>>
    %c3 = arith.constant 3 : index
    %82 = memref.load %arg6[%c3] : memref<8xf32, #tpu.memory_space<smem>>
    %83 = vector.broadcast %81 : f32 to vector<2x1xf32>
    %84 = vector.broadcast %82 : f32 to vector<2x1xf32>
    %85 = arith.select %15, %83, %84 : vector<2x1xi1>, vector<2x1xf32>
    %c2_27 = arith.constant 2 : index
    %86 = memref.load %arg7[%c2_27] : memref<8xf32, #tpu.memory_space<smem>>
    %c3_28 = arith.constant 3 : index
    %87 = memref.load %arg7[%c3_28] : memref<8xf32, #tpu.memory_space<smem>>
    %88 = vector.broadcast %86 : f32 to vector<2x1xf32>
    %89 = vector.broadcast %87 : f32 to vector<2x1xf32>
    %90 = arith.select %15, %88, %89 : vector<2x1xi1>, vector<2x1xf32>
    %c2_29 = arith.constant 2 : index
    %91 = memref.load %arg8[%c2_29] : memref<8xf32, #tpu.memory_space<smem>>
    %c3_30 = arith.constant 3 : index
    %92 = memref.load %arg8[%c3_30] : memref<8xf32, #tpu.memory_space<smem>>
    %93 = vector.broadcast %91 : f32 to vector<2x1xf32>
    %94 = vector.broadcast %92 : f32 to vector<2x1xf32>
    %95 = arith.select %15, %93, %94 : vector<2x1xi1>, vector<2x1xf32>
    %c2_31 = arith.constant 2 : index
    %96 = memref.load %arg9[%c2_31] : memref<8xf32, #tpu.memory_space<smem>>
    %c3_32 = arith.constant 3 : index
    %97 = memref.load %arg9[%c3_32] : memref<8xf32, #tpu.memory_space<smem>>
    %98 = vector.broadcast %96 : f32 to vector<2x1xf32>
    %99 = vector.broadcast %97 : f32 to vector<2x1xf32>
    %100 = arith.select %15, %98, %99 : vector<2x1xi1>, vector<2x1xf32>
    %101 = vector.broadcast %85 : vector<2x1xf32> to vector<2x1024xf32>
    %102 = arith.addf %40, %101 : vector<2x1024xf32>
    %cst_33 = arith.constant 2.500000e-01 : f32
    %103 = vector.broadcast %cst_33 : f32 to vector<1x1024xf32>
    %104 = arith.subf %4, %103 : vector<1x1024xf32>
    %105 = vector.broadcast %104 : vector<1x1024xf32> to vector<2x1024xf32>
    %106 = vector.broadcast %90 : vector<2x1xf32> to vector<2x1024xf32>
    %107 = arith.mulf %105, %106 : vector<2x1024xf32>
    %108 = arith.addf %102, %107 : vector<2x1024xf32>
    %109 = vector.broadcast %95 : vector<2x1xf32> to vector<2x1024xf32>
    %110 = arith.maximumf %109, %108 : vector<2x1024xf32>
    %111 = vector.broadcast %100 : vector<2x1xf32> to vector<2x1024xf32>
    %112 = arith.minimumf %111, %110 : vector<2x1024xf32>
    %cst_34 = arith.constant 2.500000e-01 : f32
    %113 = vector.broadcast %cst_34 : f32 to vector<1x1024xf32>
    %114 = arith.cmpf oge, %4, %113 : vector<1x1024xf32>
    %cst_35 = arith.constant 5.000000e-01 : f32
    %115 = vector.broadcast %cst_35 : f32 to vector<1x1024xf32>
    %116 = arith.cmpf olt, %4, %115 : vector<1x1024xf32>
    %117 = arith.andi %114, %116 : vector<1x1024xi1>
    %cst_36 = arith.constant 0.000000e+00 : f32
    %118 = vector.shape_cast %117 : vector<1x1024xi1> to vector<1x1024xi1>
    %119 = vector.broadcast %118 : vector<1x1024xi1> to vector<2x1024xi1>
    %120 = vector.broadcast %cst_36 : f32 to vector<2x1024xf32>
    %121 = arith.select %119, %112, %120 : vector<2x1024xi1>, vector<2x1024xf32>
    %122 = arith.addf %80, %121 : vector<2x1024xf32>
    %c4 = arith.constant 4 : index
    %123 = memref.load %arg6[%c4] : memref<8xf32, #tpu.memory_space<smem>>
    %c5 = arith.constant 5 : index
    %124 = memref.load %arg6[%c5] : memref<8xf32, #tpu.memory_space<smem>>
    %125 = vector.broadcast %123 : f32 to vector<2x1xf32>
    %126 = vector.broadcast %124 : f32 to vector<2x1xf32>
    %127 = arith.select %15, %125, %126 : vector<2x1xi1>, vector<2x1xf32>
    %c4_37 = arith.constant 4 : index
    %128 = memref.load %arg7[%c4_37] : memref<8xf32, #tpu.memory_space<smem>>
    %c5_38 = arith.constant 5 : index
    %129 = memref.load %arg7[%c5_38] : memref<8xf32, #tpu.memory_space<smem>>
    %130 = vector.broadcast %128 : f32 to vector<2x1xf32>
    %131 = vector.broadcast %129 : f32 to vector<2x1xf32>
    %132 = arith.select %15, %130, %131 : vector<2x1xi1>, vector<2x1xf32>
    %c4_39 = arith.constant 4 : index
    %133 = memref.load %arg8[%c4_39] : memref<8xf32, #tpu.memory_space<smem>>
    %c5_40 = arith.constant 5 : index
    %134 = memref.load %arg8[%c5_40] : memref<8xf32, #tpu.memory_space<smem>>
    %135 = vector.broadcast %133 : f32 to vector<2x1xf32>
    %136 = vector.broadcast %134 : f32 to vector<2x1xf32>
    %137 = arith.select %15, %135, %136 : vector<2x1xi1>, vector<2x1xf32>
    %c4_41 = arith.constant 4 : index
    %138 = memref.load %arg9[%c4_41] : memref<8xf32, #tpu.memory_space<smem>>
    %c5_42 = arith.constant 5 : index
    %139 = memref.load %arg9[%c5_42] : memref<8xf32, #tpu.memory_space<smem>>
    %140 = vector.broadcast %138 : f32 to vector<2x1xf32>
    %141 = vector.broadcast %139 : f32 to vector<2x1xf32>
    %142 = arith.select %15, %140, %141 : vector<2x1xi1>, vector<2x1xf32>
    %143 = vector.broadcast %127 : vector<2x1xf32> to vector<2x1024xf32>
    %144 = arith.addf %40, %143 : vector<2x1024xf32>
    %cst_43 = arith.constant 5.000000e-01 : f32
    %145 = vector.broadcast %cst_43 : f32 to vector<1x1024xf32>
    %146 = arith.subf %4, %145 : vector<1x1024xf32>
    %147 = vector.broadcast %146 : vector<1x1024xf32> to vector<2x1024xf32>
    %148 = vector.broadcast %132 : vector<2x1xf32> to vector<2x1024xf32>
    %149 = arith.mulf %147, %148 : vector<2x1024xf32>
    %150 = arith.addf %144, %149 : vector<2x1024xf32>
    %151 = vector.broadcast %137 : vector<2x1xf32> to vector<2x1024xf32>
    %152 = arith.maximumf %151, %150 : vector<2x1024xf32>
    %153 = vector.broadcast %142 : vector<2x1xf32> to vector<2x1024xf32>
    %154 = arith.minimumf %153, %152 : vector<2x1024xf32>
    %cst_44 = arith.constant 5.000000e-01 : f32
    %155 = vector.broadcast %cst_44 : f32 to vector<1x1024xf32>
    %156 = arith.cmpf oge, %4, %155 : vector<1x1024xf32>
    %cst_45 = arith.constant 7.500000e-01 : f32
    %157 = vector.broadcast %cst_45 : f32 to vector<1x1024xf32>
    %158 = arith.cmpf olt, %4, %157 : vector<1x1024xf32>
    %159 = arith.andi %156, %158 : vector<1x1024xi1>
    %cst_46 = arith.constant 0.000000e+00 : f32
    %160 = vector.shape_cast %159 : vector<1x1024xi1> to vector<1x1024xi1>
    %161 = vector.broadcast %160 : vector<1x1024xi1> to vector<2x1024xi1>
    %162 = vector.broadcast %cst_46 : f32 to vector<2x1024xf32>
    %163 = arith.select %161, %154, %162 : vector<2x1024xi1>, vector<2x1024xf32>
    %164 = arith.addf %122, %163 : vector<2x1024xf32>
    %c6 = arith.constant 6 : index
    %165 = memref.load %arg6[%c6] : memref<8xf32, #tpu.memory_space<smem>>
    %c7 = arith.constant 7 : index
    %166 = memref.load %arg6[%c7] : memref<8xf32, #tpu.memory_space<smem>>
    %167 = vector.broadcast %165 : f32 to vector<2x1xf32>
    %168 = vector.broadcast %166 : f32 to vector<2x1xf32>
    %169 = arith.select %15, %167, %168 : vector<2x1xi1>, vector<2x1xf32>
    %c6_47 = arith.constant 6 : index
    %170 = memref.load %arg7[%c6_47] : memref<8xf32, #tpu.memory_space<smem>>
    %c7_48 = arith.constant 7 : index
    %171 = memref.load %arg7[%c7_48] : memref<8xf32, #tpu.memory_space<smem>>
    %172 = vector.broadcast %170 : f32 to vector<2x1xf32>
    %173 = vector.broadcast %171 : f32 to vector<2x1xf32>
    %174 = arith.select %15, %172, %173 : vector<2x1xi1>, vector<2x1xf32>
    %c6_49 = arith.constant 6 : index
    %175 = memref.load %arg8[%c6_49] : memref<8xf32, #tpu.memory_space<smem>>
    %c7_50 = arith.constant 7 : index
    %176 = memref.load %arg8[%c7_50] : memref<8xf32, #tpu.memory_space<smem>>
    %177 = vector.broadcast %175 : f32 to vector<2x1xf32>
    %178 = vector.broadcast %176 : f32 to vector<2x1xf32>
    %179 = arith.select %15, %177, %178 : vector<2x1xi1>, vector<2x1xf32>
    %c6_51 = arith.constant 6 : index
    %180 = memref.load %arg9[%c6_51] : memref<8xf32, #tpu.memory_space<smem>>
    %c7_52 = arith.constant 7 : index
    %181 = memref.load %arg9[%c7_52] : memref<8xf32, #tpu.memory_space<smem>>
    %182 = vector.broadcast %180 : f32 to vector<2x1xf32>
    %183 = vector.broadcast %181 : f32 to vector<2x1xf32>
    %184 = arith.select %15, %182, %183 : vector<2x1xi1>, vector<2x1xf32>
    %185 = vector.broadcast %169 : vector<2x1xf32> to vector<2x1024xf32>
    %186 = arith.addf %40, %185 : vector<2x1024xf32>
    %cst_53 = arith.constant 7.500000e-01 : f32
    %187 = vector.broadcast %cst_53 : f32 to vector<1x1024xf32>
    %188 = arith.subf %4, %187 : vector<1x1024xf32>
    %189 = vector.broadcast %188 : vector<1x1024xf32> to vector<2x1024xf32>
    %190 = vector.broadcast %174 : vector<2x1xf32> to vector<2x1024xf32>
    %191 = arith.mulf %189, %190 : vector<2x1024xf32>
    %192 = arith.addf %186, %191 : vector<2x1024xf32>
    %193 = vector.broadcast %179 : vector<2x1xf32> to vector<2x1024xf32>
    %194 = arith.maximumf %193, %192 : vector<2x1024xf32>
    %195 = vector.broadcast %184 : vector<2x1xf32> to vector<2x1024xf32>
    %196 = arith.minimumf %195, %194 : vector<2x1024xf32>
    %cst_54 = arith.constant 7.500000e-01 : f32
    %197 = vector.broadcast %cst_54 : f32 to vector<1x1024xf32>
    %198 = arith.cmpf oge, %4, %197 : vector<1x1024xf32>
    %cst_55 = arith.constant 1.000000e+00 : f32
    %199 = vector.broadcast %cst_55 : f32 to vector<1x1024xf32>
    %200 = arith.cmpf ole, %4, %199 : vector<1x1024xf32>
    %201 = arith.andi %198, %200 : vector<1x1024xi1>
    %cst_56 = arith.constant 0.000000e+00 : f32
    %202 = vector.shape_cast %201 : vector<1x1024xi1> to vector<1x1024xi1>
    %203 = vector.broadcast %202 : vector<1x1024xi1> to vector<2x1024xi1>
    %204 = vector.broadcast %cst_56 : f32 to vector<2x1024xf32>
    %205 = arith.select %203, %196, %204 : vector<2x1024xi1>, vector<2x1024xf32>
    %206 = arith.addf %164, %205 : vector<2x1024xf32>
    %c0_57 = arith.constant 0 : index
    %c0_58 = arith.constant 0 : index
    %207 = vector.load %arg10[%c0_57, %c0_58] : memref<2x1024xf32, #tpu.memory_space<vmem>>, vector<2x1024xf32>
    tpu.vector_store %arg10[%c0_57, %c0_58], %206 {strides = array<i32>} : memref<2x1024xf32, #tpu.memory_space<vmem>>, vector<2x1024xf32>,
    return
  }
  func.func @transform_0(%arg0: i32) -> i32 {
    %c0_i32 = arith.constant 0 : i32
    %c0_i32_0 = arith.constant 0 : i32
    return %c0_i32 : i32
  }
  func.func @transform_1(%arg0: i32) -> (i32, i32) {
    %c0_i32 = arith.constant 0 : i32
    %c0_i32_0 = arith.constant 0 : i32
    return %c0_i32, %arg0 : i32, i32
  }
  func.func @transform_2(%arg0: i32) -> (i32, i32) {
    %c0_i32 = arith.constant 0 : i32
    %c0_i32_0 = arith.constant 0 : i32
    %c0_i32_1 = arith.constant 0 : i32
    return %c0_i32, %c0_i32_0 : i32, i32
  }
  func.func @transform_3(%arg0: i32) -> (i32, i32) {
    %c0_i32 = arith.constant 0 : i32
    %c0_i32_0 = arith.constant 0 : i32
    %c0_i32_1 = arith.constant 0 : i32
    return %c0_i32, %c0_i32_0 : i32, i32
  }
  func.func @transform_4(%arg0: i32) -> i32 {
    %c0_i32 = arith.constant 0 : i32
    %c0_i32_0 = arith.constant 0 : i32
    return %c0_i32 : i32
  }
  func.func @transform_5(%arg0: i32) -> i32 {
    %c0_i32 = arith.constant 0 : i32
    %c0_i32_0 = arith.constant 0 : i32
    return %c0_i32 : i32
  }
  func.func @transform_6(%arg0: i32) -> i32 {
    %c0_i32 = arith.constant 0 : i32
    %c0_i32_0 = arith.constant 0 : i32
    return %c0_i32 : i32
  }
  func.func @transform_7(%arg0: i32) -> i32 {
    %c0_i32 = arith.constant 0 : i32
    %c0_i32_0 = arith.constant 0 : i32
    return %c0_i32 : i32
  }
  func.func @transform_8(%arg0: i32) -> i32 {
    %c0_i32 = arith.constant 0 : i32
    %c0_i32_0 = arith.constant 0 : i32
    return %c0_i32 : i32
  }
  func.func @transform_9(%arg0: i32) -> (i32, i32) {
    %c0_i32 = arith.constant 0 : i32
    %c0_i32_0 = arith.constant 0 : i32
    return %c0_i32, %arg0 : i32, i32
  }
}

</mosaic_0001>

<bundles_post_ra>
// kernel: _lambda_forward_impl.1
= control target key start
LH: loop header
LB: loop body
LE: loop exit
PB: predicated region body
PF: predicated region fallthrough
CT: control target
= control target key end

     0   :  { %15 = vsyncpa [#allocation4], 0  ;;  %s4688_s0 = inlined_call_operand.<no memory space> [shape: f32[1], index: 0, kind: input, shape index: {}]   ;;  %s4689_s1 = inlined_call_operand.vmem [shape: f32[1,1024], index: 1, kind: input, shape index: {}]   ;;  %s4690_s2 = inlined_call_operand.vmem [shape: f32[200,2], index: 2, kind: input, shape index: {}]   ;;  %s4691_s3 = inlined_call_operand.vmem [shape: f32[2,200], index: 3, kind: input, shape index: {}]   ;;  %s4692_s4 = inlined_call_operand.vmem [shape: f32[2], index: 4, kind: input, shape index: {}]   ;;  %s4693_s5 = inlined_call_operand.vmem [shape: f32[8], index: 5, kind: input, shape index: {}]   ;;  %s4694_s6 = inlined_call_operand.vmem [shape: f32[8], index: 6, kind: input, shape index: {}]   ;;  %s4695_s7 = inlined_call_operand.vmem [shape: f32[8], index: 7, kind: input, shape index: {}]   ;;  %s4696_s8 = inlined_call_operand.vmem [shape: f32[8], index: 8, kind: input, shape index: {}]   ;;  %s4697_s9 = inlined_call_operand.vmem [shape: f32[2,1024], index: 9, kind: output, shape index: {}]  }
   0x1   :  { %16 = vsyncpa [#allocation6], 0  ;;  %s42_s11 = sshll.u32 %s4693_s5, 4  ;;  %s43_s11 = int_to_ptr.vmem [resolvable:$true] %s42_s11 }
   0x2   :  { %17 = vsyncpa [#allocation9], 0  ;;  %s62_s14 = sshll.u32 %s4695_s7, 4  ;;  %s2678_s15 = scalar_lea.vmem %s43_s11, 16  ;;  %s63_s14 = int_to_ptr.vmem [resolvable:$true] %s62_s14 }
   0x3   :  { %p2679_p0 = scmp.ne.s32.totalorder %s43_s11, %s2678_s15  ;;  %p2683_p1 = scmp.lt.s32.totalorder %s43_s11, %s43_s11 }
   0x4   :  { %p2684_p2 = scmp.lt.s32.totalorder %s2678_s15, %s2678_s15 }
   0x6   :  { %p2685_p3 = por %p2684_p2, %p2683_p1 }
   0x8   :  { %p2686_p4 = pnand %p2685_p3, %p2679_p0 }
   0xa   :  { %2689 = shalt.err (!%p2686_p4)
}
   0xb   :  { %s2744_s16 = smov [#allocation5]   ;;  %s2690_s17 = scalar_lea.vmem %s63_s14, 16 }
   0xc   :  { %45 = dma.vmem_to_smem %s43_s11, 16, %s2744_s16, [#allocation6]  }
   0xd   :  { %p2691_p5 = scmp.ne.s32.totalorder %s63_s14, %s2690_s17  ;;  %p2695_p6 = scmp.lt.s32.totalorder %s63_s14, %s63_s14 }
   0xe   :  { %p2696_p7 = scmp.lt.s32.totalorder %s2690_s17, %s2690_s17 }
  0x10   :  { %p2697_p8 = por %p2696_p7, %p2695_p6 }
  0x12   :  { %p2698_p9 = pnand %p2697_p8, %p2691_p5 }
  0x14   :  { %2701 = shalt.err (!%p2698_p9)
}
  0x15   :  { %s2745_s5 = smov [#allocation8]   ;;  %s32_s19 = sshll.u32 %s4692_s4, 4  ;;  %s33_s19 = int_to_ptr.vmem [resolvable:$true] %s32_s19 }
  0x16   :  { %65 = dma.vmem_to_smem %s63_s14, 16, %s2745_s5, [#allocation9]  }
  0x17   :  { %s52_s22 = sshll.u32 %s4694_s6, 4  ;;  %s2702_s23 = scalar_lea.vmem %s33_s19, 16  ;;  %s53_s22 = int_to_ptr.vmem [resolvable:$true] %s52_s22 }
  0x18   :  { %p2703_p10 = scmp.ne.s32.totalorder %s33_s19, %s2702_s23  ;;  %p2707_p11 = scmp.lt.s32.totalorder %s33_s19, %s33_s19 }
  0x19   :  { %p2708_p12 = scmp.lt.s32.totalorder %s2702_s23, %s2702_s23 }
  0x1b   :  { %p2709_p13 = por %p2708_p12, %p2707_p11 }
  0x1d   :  { %p2710_p0 = pnand %p2709_p13, %p2703_p10 }
  0x1f   :  { %2713 = shalt.err (!%p2710_p0)
}
  0x20   :  { %s2746_s24 = smov [#allocation3]   ;;  %s2714_s25 = scalar_lea.vmem %s53_s22, 16 }
  0x21   :  { %35 = dma.vmem_to_smem %s33_s19, 16, %s2746_s24, [#allocation4]  }
  0x22   :  { %p2715_p1 = scmp.ne.s32.totalorder %s53_s22, %s2714_s25  ;;  %p2719_p2 = scmp.lt.s32.totalorder %s53_s22, %s53_s22 }
  0x23   :  { %p2720_p3 = scmp.lt.s32.totalorder %s2714_s25, %s2714_s25 }
  0x25   :  { %p2721_p4 = por %p2720_p3, %p2719_p2 }
  0x27   :  { %p2722_p5 = pnand %p2721_p4, %p2715_p1 }
  0x29   :  { %2725 = shalt.err (!%p2722_p5)
}
  0x2a   :  { %s2747_s4 = smov [#allocation7]   ;;  %s72_s27 = sshll.u32 %s4696_s8, 4  ;;  %s73_s27 = int_to_ptr.vmem [resolvable:$true] %s72_s27 }
  0x2b   :  { %55 = dma.vmem_to_smem %s53_s22, 16, %s2747_s4, [#allocation6]  }
  0x2c   :  { %s2726_s28 = scalar_lea.vmem %s73_s27, 16  ;;  %p2731_p7 = scmp.lt.s32.totalorder %s73_s27, %s73_s27 }
  0x2d   :  { %p2727_p6 = scmp.ne.s32.totalorder %s73_s27, %s2726_s28  ;;  %p2732_p8 = scmp.lt.s32.totalorder %s2726_s28, %s2726_s28 }
  0x2f   :  { %p2733_p9 = por %p2732_p8, %p2731_p7 }
  0x31   :  { %p2734_p10 = pnand %p2733_p9, %p2727_p6 }
  0x33   :  { %2737 = shalt.err (!%p2734_p10)
}
  0x34   :  { %s2748_s29 = smov [#allocation10]  }
  0x35   :  { %75 = dma.vmem_to_smem %s73_s27, 16, %s2748_s29, [#allocation9]  }
  0x36   :  { %2738 = dma.done.wait [#allocation4], 16  }
  0x37   :  { %2739 = vsyncadd [#allocation4], 4294967280 }
  0x38   :  { %2740 = dma.done.wait [#allocation6], 32  }
  0x39   :  { %2741 = vsyncadd [#allocation6], 4294967264 }
  0x3a   :  { %2742 = dma.done.wait [#allocation9], 32  }
  0x3b   :  { %2743 = vsyncadd [#allocation9], 4294967264 }
  0x3c   :  { %91 = sfence }
  0x3d   :  { %v101_v0 = vld [vmem:[%s4690_s2 + $0x10] sm:$0xff]  ;;  %v99_v1 = vld [vmem:[%s4690_s2] sm:$0xff]  ;;  %v93_v2 = vstv %s4688_s0  ;;  %v2749_v3 = vmov 1   ;;  %v100_v5 = vld [vmem:[%s4690_s2 + $0x8] sm:$0xff]  ;;  %v4698_v8 = vmov 0   ;;  %v250_v31 = vlaneseq  ;;  %s3809_s10 = sld [smem:[#allocation7 + $0x2]] }
  0x3e   :  { %2250 = vset.pattern.permute.xlu0 %v2749_v3  ;;  %2248 = vset.pattern.permute.xlu1 %v2749_v3  ;;  %2275 = vrcp.f32 %v93_v2  ;;  %v105_v4 = vld [vmem:[%s4690_s2 + $0x30] sm:$0xff]  ;;  %v102_v7 = vld [vmem:[%s4690_s2 + $0x18] sm:$0xff]  ;;  %v103_v12 = vld [vmem:[%s4690_s2 + $0x20] sm:$0xff]  ;;  %vm1009_vm0 = vcmask 588800   ;;  %s3811_s8 = sld [smem:[#allocation7 + $0x3]]  ;;  %s3817_s11 = sld [smem:[#allocation7 + $0x4]] }
  0x3f   :  { %499 = vperm.xlu0 %2250, %v101_v0   ;;  %491 = vperm.xlu1 %2248, %v99_v1   ;;  %v109_v6 = vld [vmem:[%s4690_s2 + $0x50] sm:$0xff]  ;;  %v104_v13 = vld [vmem:[%s4690_s2 + $0x28] sm:$0xff]  ;;  %v106_v14 = vld [vmem:[%s4690_s2 + $0x38] sm:$0xff]  ;;  %v2928_v34 = vshrl.u32 %v250_v31, 7  ;;  %s3819_s12 = sld [smem:[#allocation7 + $0x5]]  ;;  %s3831_s13 = sld [smem:[#allocation7 + $0x6]] }
  0x40   :  { %v113_v10 = vld [vmem:[%s4690_s2 + $0x70] sm:$0xff]  ;;  %v108_v15 = vld [vmem:[%s4690_s2 + $0x48] sm:$0xff]  ;;  %v107_v16 = vld [vmem:[%s4690_s2 + $0x40] sm:$0xff]  ;;  %s3833_s14 = sld [smem:[#allocation7 + $0x7]]  ;;  %s1359_s17 = sld [smem:[#allocation7]] }
  0x41   :  { %v117_v11 = vld [vmem:[%s4690_s2 + $0x90] sm:$0xff]  ;;  %v112_v17 = vld [vmem:[%s4690_s2 + $0x68] sm:$0xff]  ;;  %v110_v19 = vld [vmem:[%s4690_s2 + $0x58] sm:$0xff]  ;;  %4786 = vst [vmem:[#allocation15_spill] sm:$0xff] %v2928_v34  ;;  %v2939_v39 = vsub.s32 1, %v2928_v34  ;;  %v2944_v41 = vsub.s32 3, %v2928_v34 }
  0x42   :  { %v116_v18 = vld [vmem:[%s4690_s2 + $0x88] sm:$0xff]  ;;  %v111_v21 = vld [vmem:[%s4690_s2 + $0x60] sm:$0xff]  ;;  %v121_v22 = vld [vmem:[%s4690_s2 + $0xb0] sm:$0xff]  ;;  %v2947_v42 = vsub.s32 0, %v2928_v34  ;;  %v2969_v49 = vsub.s32 2, %v2928_v34  ;;  %s2019_s5 = sld [smem:[#allocation7 + $0x1]] }
  0x43   :  { %515 = vperm.xlu0 %2250, %v105_v4   ;;  %495 = vperm.xlu1 %2248, %v100_v5   ;;  %v120_v20 = vld [vmem:[%s4690_s2 + $0xa8] sm:$0xff]  ;;  %v123_v23 = vld [vmem:[%s4690_s2 + $0xc0] sm:$0xff]  ;;  %v114_v24 = vld [vmem:[%s4690_s2 + $0x78] sm:$0xff]  ;;  %4789 = vst [vmem:[#allocation18_spill] sm:$0xff] %v2939_v39  ;;  %s993_s0 = sld [smem:[#allocation3]]  ;;  %s2008_s7 = sld [smem:[#allocation3 + $0x1]] }
  0x44   :  { %v115_v25 = vld [vmem:[%s4690_s2 + $0x80] sm:$0xff]  ;;  %v118_v26 = vld [vmem:[%s4690_s2 + $0x98] sm:$0xff]  ;;  %4790 = vst [vmem:[#allocation19_spill] sm:$0xff] %v2944_v41  ;;  %4791 = vst [vmem:[#allocation20_spill] sm:$0xff] %v2947_v42  ;;  %s4030_s18 = sld [smem:[#allocation5 + $0x1]]  ;;  %s4039_s19 = sld [smem:[#allocation8]] }
  0x45   :  { %v119_v27 = vld [vmem:[%s4690_s2 + $0xa0] sm:$0xff]  ;;  %v122_v28 = vld [vmem:[%s4690_s2 + $0xb8] sm:$0xff]  ;;  %4796 = vst [vmem:[#allocation25_spill] sm:$0xff] %v2969_v49  ;;  %s4041_s20 = sld [smem:[#allocation8 + $0x1]]  ;;  %s4052_s21 = sld [smem:[#allocation10]] }
  0x46   :  { %v96_v35 = vld [vmem:[%s4689_s1] sm:$0xff]  ;;  %s4054_s22 = sld [smem:[#allocation10 + $0x1]]  ;;  %s4067_s23 = sld [smem:[#allocation5 + $0x2]] }
  0x47   :  { %531 = vperm.xlu0 %2250, %v109_v6   ;;  %2249 = vset.pattern.permute.xlu1 %v4698_v8  ;;  %s4069_s24 = sld [smem:[#allocation5 + $0x3]]  ;;  %s4080_s25 = sld [smem:[#allocation8 + $0x2]] }
  0x48   :  { %v2276_v9 = vpop.eup %2275  ;;  %141 = vperm.xlu1 %2249, %v102_v7   ;;  %s4082_s4 = sld [smem:[#allocation8 + $0x3]]  ;;  %s4092_s6 = sld [smem:[#allocation10 + $0x2]] }
  0x49   :  { %2238 = vpush %v2276_v9  ;;  %s4094_s26 = sld [smem:[#allocation10 + $0x3]]  ;;  %s4105_s27 = sld [smem:[#allocation5 + $0x4]] }
  0x4a   :  { %s4119_s29 = sld [smem:[#allocation8 + $0x4]]  ;;  %s4121_s30 = sld [smem:[#allocation8 + $0x5]] }
  0x4b   :  { %547 = vperm.xlu0 %2250, %v113_v10   ;;  %s4133_s1 = sld [smem:[#allocation10 + $0x4]]  ;;  %s4135_s2 = sld [smem:[#allocation10 + $0x5]] }
  0x4c   :  { %2251 = vset.pattern.permute.xlu1 %v2749_v3 }
  0x4d   :  { %503 = vperm.xlu1 %2251, %v102_v7  }
  0x4f   :  { %563 = vperm.xlu0 %2250, %v117_v11  }
  0x51   :  { %2252 = vset.pattern.permute.xlu1 %v4698_v8 }
  0x52   :  { %146 = vperm.xlu1 %2252, %v103_v12  }
  0x53   :  { %2267 = vset.pattern.permute.xlu0 %v4698_v8 }
  0x54   :  { %126 = vperm.xlu0 %2267, %v99_v1  }
  0x56   :  { %2253 = vset.pattern.permute.xlu1 %v2749_v3 }
  0x57   :  { %507 = vperm.xlu1 %2253, %v103_v12  }
  0x58   :  { %131 = vperm.xlu0 %2267, %v100_v5  }
  0x5b   :  { %511 = vperm.xlu1 %2253, %v104_v13  }
  0x5c   :  { %136 = vperm.xlu0 %2267, %v101_v0  }
  0x5f   :  { %2254 = vset.pattern.permute.xlu1 %v4698_v8 }
  0x60   :  { %151 = vperm.xlu0 %2267, %v104_v13   ;;  %161 = vperm.xlu1 %2254, %v106_v14  }
  0x64   :  { %156 = vperm.xlu0 %2267, %v105_v4   ;;  %2255 = vset.pattern.permute.xlu1 %v2749_v3 }
  0x65   :  { %519 = vperm.xlu1 %2255, %v106_v14  }
  0x68   :  { %171 = vperm.xlu0 %2267, %v108_v15  }
  0x69   :  { %2256 = vset.pattern.permute.xlu1 %v4698_v8 }
  0x6a   :  { %166 = vperm.xlu1 %2256, %v107_v16  }
  0x6c   :  { %176 = vperm.xlu0 %2267, %v109_v6  }
  0x6e   :  { %2257 = vset.pattern.permute.xlu1 %v2749_v3 }
  0x6f   :  { %523 = vperm.xlu1 %2257, %v107_v16  }
  0x70   :  { %191 = vperm.xlu0 %2267, %v112_v17  }
  0x73   :  { %527 = vperm.xlu1 %2257, %v108_v15  }
  0x74   :  { %196 = vperm.xlu0 %2267, %v113_v10  }
  0x77   :  { %2258 = vset.pattern.permute.xlu1 %v4698_v8 }
  0x78   :  { %211 = vperm.xlu0 %2267, %v116_v18   ;;  %181 = vperm.xlu1 %2258, %v110_v19  }
  0x7a   :  { %s2239_s28 = spop %2238 }
  0x7b   :  { %v97_v36 = vstv %s2239_s28  ;;  %s4107_s28 = sld [smem:[#allocation5 + $0x5]] }
  0x7c   :  { %216 = vperm.xlu0 %2267, %v117_v11   ;;  %2259 = vset.pattern.permute.xlu1 %v2749_v3  ;;  %v2936_v38 = vmul.f32 %v97_v36, %v96_v35 }
  0x7d   :  { %535 = vperm.xlu1 %2259, %v110_v19  }
  0x7e   :  { %4788 = vst [vmem:[#allocation17_spill] sm:$0xff] %v2936_v38  ;;  %v2954_v44 = vrot.slane %v2936_v38, %v2939_v39  ;;  %v2958_v45 = vrot.slane %v2936_v38, %v2944_v41  ;;  %v2964_v47 = vrot.slane %v2936_v38, %v2947_v42  ;;  %v2983_v56 = vrot.slane %v2936_v38, %v2969_v49 }
  0x80   :  { %231 = vperm.xlu0 %2267, %v120_v20   ;;  %4793 = vst [vmem:[#allocation22_spill] sm:$0xff] %v2954_v44  ;;  %4794 = vst [vmem:[#allocation23_spill] sm:$0xff] %v2964_v47 }
  0x81   :  { %2260 = vset.pattern.permute.xlu1 %v4698_v8 }
  0x82   :  { %186 = vperm.xlu1 %2260, %v111_v21  }
  0x84   :  { %236 = vperm.xlu0 %2267, %v121_v22  }
  0x86   :  { %2261 = vset.pattern.permute.xlu1 %v2749_v3 }
  0x87   :  { %539 = vperm.xlu1 %2261, %v111_v21  }
  0x88   :  { %2272 = vset.pattern.permute.xlu0 %v2749_v3 }
  0x89   :  { %579 = vperm.xlu0 %2272, %v121_v22  }
  0x8b   :  { %543 = vperm.xlu1 %2261, %v112_v17  }
  0x8d   :  { %587 = vperm.xlu0 %2272, %v123_v23  }
  0x8f   :  { %2262 = vset.pattern.permute.xlu1 %v4698_v8 }
  0x90   :  { %201 = vperm.xlu1 %2262, %v114_v24  }
  0x94   :  { %2263 = vset.pattern.permute.xlu1 %v2749_v3 }
  0x95   :  { %551 = vperm.xlu1 %2263, %v114_v24  }
  0x99   :  { %2264 = vset.pattern.permute.xlu1 %v4698_v8 }
  0x9a   :  { %206 = vperm.xlu1 %2264, %v115_v25  }
  0x9e   :  { %2265 = vset.pattern.permute.xlu1 %v2749_v3 }
  0x9f   :  { %555 = vperm.xlu1 %2265, %v115_v25  }
  0xa3   :  { %559 = vperm.xlu1 %2265, %v116_v18  }
  0xa7   :  { %2266 = vset.pattern.permute.xlu1 %v4698_v8 }
  0xa8   :  { %221 = vperm.xlu1 %2266, %v118_v26  }
  0xac   :  { %2268 = vset.pattern.permute.xlu1 %v2749_v3 }
  0xad   :  { %567 = vperm.xlu1 %2268, %v118_v26  }
  0xb1   :  { %2269 = vset.pattern.permute.xlu1 %v4698_v8 }
  0xb2   :  { %226 = vperm.xlu1 %2269, %v119_v27  }
  0xb6   :  { %2270 = vset.pattern.permute.xlu1 %v2749_v3 }
  0xb7   :  { %571 = vperm.xlu1 %2270, %v119_v27  }
  0xbb   :  { %575 = vperm.xlu1 %2270, %v120_v20  }
  0xbe   :  { %v2919_v29 = vpop.permute.xlu1 %491  ;;  %v2921_v30 = vpop.permute.xlu0 %499 }
  0xbf   :  { %2271 = vset.pattern.permute.xlu1 %v4698_v8 }
  0xc0   :  { %241 = vperm.xlu1 %2271, %v122_v28  }
  0xc2   :  { %v2924_v32 = vpop.permute.xlu1 %495  ;;  %v2926_v33 = vpop.permute.xlu0 %515 }
  0xc3   :  { %4785 = vst [vmem:[#allocation14_spill] sm:$0xff] %v2926_v33 }
  0xc4   :  { %2273 = vset.pattern.permute.xlu1 %v2749_v3 }
  0xc5   :  { %583 = vperm.xlu1 %2273, %v122_v28  }
  0xc6   :  { %v2934_v37 = vpop.permute.xlu0 %531 }
  0xc7   :  { %4787 = vst [vmem:[#allocation16_spill] sm:$0xff] %v2934_v37  ;;  %v2941_v40 = vpop.permute.xlu1 %141 }
  0xc8   :  { %v315_v50 = vmul.f32 %v2954_v44, %v2941_v40  ;;  %v317_v51 = vmul.f32 %v2958_v45, %v2941_v40  ;;  %v314_v54 = vmul.f32 %v2964_v47, %v2941_v40  ;;  %v316_v12 = vmul.f32 %v2983_v56, %v2941_v40 }
  0xc9   :  { %2274 = vset.pattern.permute.xlu1 %v4698_v8 }
  0xca   :  { %246 = vperm.xlu1 %2274, %v123_v23   ;;  %v2950_v43 = vpop.permute.xlu0 %547 }
  0xcb   :  { %4792 = vst [vmem:[#allocation21_spill] sm:$0xff] %v2950_v43 }
  0xcc   :  { %v2960_v46 = vpop.permute.xlu1 %503 }
  0xcd   :  { %v615_v53 = vadd.f32 %v2960_v46, %v315_v50  ;;  %v617_v55 = vadd.f32 %v2960_v46, %v317_v51  ;;  %v614_v58 = vadd.f32 %v2960_v46, %v314_v54  ;;  %v616_v18 = vadd.f32 %v2960_v46, %v316_v12 }
  0xce   :  { %v2966_v48 = vpop.permute.xlu0 %563 }
  0xcf   :  { %4795 = vst [vmem:[#allocation24_spill] sm:$0xff] %v2966_v48  ;;  %2277 = vtanh.f32 %v615_v53 }
  0xd0   :  { %2279 = vtanh.f32 %v617_v55 }
  0xd1   :  { %v2975_v52 = vpop.permute.xlu1 %146  ;;  %2281 = vtanh.f32 %v614_v58 }
  0xd2   :  { %v323_v28 = vmul.f32 %v2954_v44, %v2975_v52  ;;  %v325_v36 = vmul.f32 %v2958_v45, %v2975_v52 }
  0xd3   :  { %v2985_v57 = vpop.permute.xlu0 %126 }
  0xd4   :  { %v291_v59 = vmul.f32 %v2954_v44, %v2985_v57  ;;  %v293_v60 = vmul.f32 %v2958_v45, %v2985_v57  ;;  %v290_v61 = vmul.f32 %v2964_v47, %v2985_v57  ;;  %v292_v62 = vmul.f32 %v2983_v56, %v2985_v57 }
  0xd6   :  { %v2996_v63 = vpop.permute.xlu1 %507  ;;  %v591_v0 = vadd.f32 %v2919_v29, %v291_v59  ;;  %v593_v1 = vadd.f32 %v2919_v29, %v293_v60  ;;  %v590_v3 = vadd.f32 %v2919_v29, %v290_v61  ;;  %v592_v4 = vadd.f32 %v2919_v29, %v292_v62 }
  0xd7   :  { %4797 = vst [vmem:[#allocation26_spill] sm:$0xff] %v2996_v63  ;;  %v3000_v2 = vpop.permute.xlu0 %131  ;;  %v623_v53 = vadd.f32 %v2996_v63, %v323_v28  ;;  %v625_v62 = vadd.f32 %v2996_v63, %v325_v36 }
  0xd8   :  { %v299_v5 = vmul.f32 %v2954_v44, %v3000_v2  ;;  %2283 = vtanh.f32 %v591_v0  ;;  %v301_v6 = vmul.f32 %v2958_v45, %v3000_v2  ;;  %v298_v7 = vmul.f32 %v2964_v47, %v3000_v2 }
  0xd9   :  { %2285 = vtanh.f32 %v593_v1  ;;  %v300_v9 = vmul.f32 %v2983_v56, %v3000_v2  ;;  %v3032_v23 = vpop.eup %2277  ;;  %v322_v0 = vmul.f32 %v2964_v47, %v2975_v52 }
  0xda   :  { %v3012_v10 = vpop.permute.xlu1 %511  ;;  %v599_v11 = vadd.f32 %v2924_v32, %v299_v5  ;;  %2287 = vtanh.f32 %v590_v3  ;;  %v601_v14 = vadd.f32 %v2924_v32, %v301_v6  ;;  %v598_v15 = vadd.f32 %v2924_v32, %v298_v7  ;;  %v3042_v31 = vpop.eup %2279 }
  0xdb   :  { %4798 = vst [vmem:[#allocation27_spill] sm:$0xff] %v3012_v10  ;;  %v3017_v13 = vpop.permute.xlu0 %136  ;;  %v600_v16 = vadd.f32 %v2924_v32, %v300_v9  ;;  %2289 = vtanh.f32 %v592_v4  ;;  %v3047_v50 = vpop.eup %2281  ;;  %v622_v7 = vadd.f32 %v2996_v63, %v322_v0  ;;  %v324_v9 = vmul.f32 %v2983_v56, %v2975_v52 }
  0xdc   :  { %2291 = vtanh.f32 %v599_v11  ;;  %v307_v17 = vmul.f32 %v2954_v44, %v3017_v13  ;;  %v309_v19 = vmul.f32 %v2958_v45, %v3017_v13  ;;  %v306_v20 = vmul.f32 %v2964_v47, %v3017_v13 }
  0xdd   :  { %2293 = vtanh.f32 %v601_v14  ;;  %v308_v21 = vmul.f32 %v2983_v56, %v3017_v13 }
  0xde   :  { %2295 = vtanh.f32 %v598_v15  ;;  %v607_v22 = vadd.f32 %v2921_v30, %v307_v17  ;;  %v609_v26 = vadd.f32 %v2921_v30, %v309_v19  ;;  %v606_v27 = vadd.f32 %v2921_v30, %v306_v20 }
  0xdf   :  { %v3034_v24 = vpop.permute.xlu0 %151  ;;  %v3036_v25 = vpop.permute.xlu1 %161  ;;  %2297 = vtanh.f32 %v600_v16  ;;  %v608_v35 = vadd.f32 %v2921_v30, %v308_v21  ;;  %v624_v17 = vadd.f32 %v2996_v63, %v324_v9 }
  0xe0   :  { %4799 = vst [vmem:[#allocation28_spill] sm:$0xff] %v3036_v25  ;;  %2299 = vtanh.f32 %v616_v18  ;;  %v331_v51 = vmul.f32 %v2954_v44, %v3034_v24  ;;  %v333_v54 = vmul.f32 %v2958_v45, %v3034_v24  ;;  %v330_v58 = vmul.f32 %v2964_v47, %v3034_v24 }
  0xe1   :  { %2301 = vtanh.f32 %v607_v22  ;;  %v332_v5 = vmul.f32 %v2983_v56, %v3034_v24  ;;  %v347_v22 = vmul.f32 %v2954_v44, %v3036_v25 }
  0xe2   :  { %v2284_v55 = vpop.eup %2283  ;;  %2303 = vtanh.f32 %v609_v26  ;;  %v631_v61 = vadd.f32 %v3012_v10, %v331_v51  ;;  %v633_v4 = vadd.f32 %v3012_v10, %v333_v54  ;;  %v630_v14 = vadd.f32 %v3012_v10, %v330_v58 }
  0xe3   :  { %v2286_v59 = vpop.eup %2285  ;;  %v3056_v60 = vpop.permute.xlu0 %156  ;;  %2305 = vtanh.f32 %v606_v27  ;;  %v632_v21 = vadd.f32 %v3012_v10, %v332_v5 }
  0xe4   :  { %4800 = vst [vmem:[#allocation29_spill] sm:$0xff] %v3056_v60  ;;  %v2288_v1 = vpop.eup %2287  ;;  %v3062_v3 = vpop.permute.xlu1 %519  ;;  %2307 = vtanh.f32 %v608_v35  ;;  %v339_v11 = vmul.f32 %v2954_v44, %v3056_v60  ;;  %v341_v18 = vmul.f32 %v2958_v45, %v3056_v60  ;;  %v338_v36 = vmul.f32 %v2964_v47, %v3056_v60 }
  0xe5   :  { %4801 = vst [vmem:[#allocation30_spill] sm:$0xff] %v3062_v3  ;;  %v2290_v6 = vpop.eup %2289  ;;  %2309 = vtanh.f32 %v623_v53  ;;  %v647_v54 = vadd.f32 %v3062_v3, %v347_v22 }
  0xe6   :  { %v2292_v12 = vpop.eup %2291  ;;  %2311 = vtanh.f32 %v631_v61  ;;  %v639_v35 = vadd.f32 %v2926_v33, %v339_v11  ;;  %v346_v61 = vmul.f32 %v2964_v47, %v3036_v25 }
  0xe7   :  { %v2294_v15 = vpop.eup %2293  ;;  %v2046_v16 = vpack.c.bf16 %v2292_v12, %v2284_v55  ;;  %2313 = vtanh.f32 %v625_v62  ;;  %v349_v55 = vmul.f32 %v2958_v45, %v3036_v25  ;;  %v340_v62 = vmul.f32 %v2983_v56, %v3056_v60  ;;  %v3097_v12 = vpop.permute.xlu0 %171 }
  0xe8   :  { %v2296_v19 = vpop.eup %2295  ;;  %v2094_v20 = vpack.c.bf16 %v2294_v15, %v2286_v59  ;;  %2315 = vtanh.f32 %v633_v4  ;;  %v641_v59 = vadd.f32 %v2926_v33, %v341_v18  ;;  %v646_v9 = vadd.f32 %v3062_v3, %v346_v61  ;;  %4803 = vst [vmem:[#allocation32_spill] sm:$0xff] %v3097_v12 }
  0xe9   :  { %v2298_v26 = vpop.eup %2297  ;;  %v3079_v27 = vpop.permute.xlu1 %166  ;;  %2047 = vmatprep.subr.bf16.mxu0 %v2046_v16  ;;  %v2048_v28 = vpack.c.bf16 %v2296_v19, %v2288_v1  ;;  %2317 = vtanh.f32 %v622_v7  ;;  %v649_v4 = vadd.f32 %v3062_v3, %v349_v55  ;;  %v638_v7 = vadd.f32 %v2926_v33, %v338_v36 }
  0xea   :  { %4802 = vst [vmem:[#allocation31_spill] sm:$0xff] %v3079_v27  ;;  %v2300_v51 = vpop.eup %2299  ;;  %2095 = vmatprep.subr.bf16.mxu1 %v2094_v20  ;;  %v2096_v53 = vpack.c.bf16 %v2298_v26, %v2290_v6  ;;  %2319 = vtanh.f32 %v630_v14  ;;  %v640_v18 = vadd.f32 %v2926_v33, %v340_v62  ;;  %v363_v19 = vmul.f32 %v2954_v44, %v3097_v12 }
  0xeb   :  { %v2302_v58 = vpop.eup %2301  ;;  %2049 = vmatpush1.bf16.msra.mxu0 %v2048_v28  ;;  %2321 = vtanh.f32 %v624_v17  ;;  %v365_v28 = vmul.f32 %v2958_v45, %v3097_v12  ;;  %v354_v62 = vmul.f32 %v2964_v47, %v3079_v27 }
  0xec   :  { %v2304_v0 = vpop.eup %2303  ;;  %2097 = vmatpush1.bf16.msra.mxu1 %v2096_v53  ;;  %v2050_v1 = vpack.c.bf16 %v3032_v23, %v2302_v58  ;;  %2323 = vtanh.f32 %v632_v21  ;;  %v348_v23 = vmul.f32 %v2983_v56, %v3036_v25  ;;  %v362_v58 = vmul.f32 %v2964_v47, %v3097_v12 }
  0xed   :  { %v2306_v5 = vpop.eup %2305  ;;  %v2098_v6 = vpack.c.bf16 %v3042_v31, %v2304_v0  ;;  %2325 = vtanh.f32 %v639_v35  ;;  %v355_v31 = vmul.f32 %v2954_v44, %v3079_v27 }
  0xee   :  { %v2308_v11 = vpop.eup %2307  ;;  %2051 = vmatprep.subr.bf16.mxu0 %v2050_v1  ;;  %v3099_v14 = vpop.permute.xlu1 %523  ;;  %v2052_v15 = vpack.c.bf16 %v3047_v50, %v2306_v5  ;;  %2327 = vtanh.f32 %v647_v54  ;;  %v648_v50 = vadd.f32 %v3062_v3, %v348_v23 }
  0xef   :  { %4804 = vst [vmem:[#allocation33_spill] sm:$0xff] %v3099_v14  ;;  %v2310_v16 = vpop.eup %2309  ;;  %2099 = vmatprep.subr.bf16.mxu1 %v2098_v6  ;;  %v2100_v17 = vpack.c.bf16 %v2300_v51, %v2308_v11  ;;  %2329 = vtanh.f32 %v641_v59  ;;  %v655_v26 = vadd.f32 %v3099_v14, %v355_v31  ;;  %v357_v51 = vmul.f32 %v2958_v45, %v3079_v27  ;;  %v3123_v1 = vpop.permute.xlu0 %176 }
  0xf0   :  { %v2312_v20 = vpop.eup %2311  ;;  %2053 = vmatpush1.bf16.msra.mxu0 %v2052_v15  ;;  %2331 = vtanh.f32 %v649_v4  ;;  %4806 = vst [vmem:[#allocation35_spill] sm:$0xff] %v3123_v1  ;;  %v364_v6 = vmul.f32 %v2983_v56, %v3097_v12  ;;  %v356_v11 = vmul.f32 %v2983_v56, %v3079_v27  ;;  %v371_v15 = vmul.f32 %v2954_v44, %v3123_v1 }
  0xf1   :  { %v2314_v21 = vpop.eup %2313  ;;  %2101 = vmatpush1.bf16.msra.mxu1 %v2100_v17  ;;  %v2054_v22 = vpack.c.bf16 %v2312_v20, %v2310_v16  ;;  %2333 = vtanh.f32 %v638_v7  ;;  %v657_v61 = vadd.f32 %v3099_v14, %v357_v51  ;;  %v373_v20 = vmul.f32 %v2958_v45, %v3123_v1 }
  0xf2   :  { %v2316_v35 = vpop.eup %2315  ;;  %v3113_v36 = vpop.permute.xlu1 %527  ;;  %2335 = vtanh.f32 %v646_v9  ;;  %v654_v9 = vadd.f32 %v3099_v14, %v354_v62 }
  0xf3   :  { %4805 = vst [vmem:[#allocation34_spill] sm:$0xff] %v3113_v36  ;;  %v2318_v53 = vpop.eup %2317  ;;  %2055 = vmatprep.subr.bf16.mxu0 %v2054_v22  ;;  %v2102_v54 = vpack.c.bf16 %v2316_v35, %v2314_v21  ;;  %2337 = vtanh.f32 %v640_v18  ;;  %v663_v55 = vadd.f32 %v3113_v36, %v363_v19  ;;  %v665_v5 = vadd.f32 %v3113_v36, %v365_v28 }
  0xf4   :  { %v2320_v59 = vpop.eup %2319  ;;  %2339 = vtanh.f32 %v648_v50  ;;  %v662_v17 = vadd.f32 %v3113_v36, %v362_v58  ;;  %v656_v19 = vadd.f32 %v3099_v14, %v356_v11  ;;  %v664_v22 = vadd.f32 %v3113_v36, %v364_v6 }
  0xf5   :  { %v2322_v0 = vpop.eup %2321  ;;  %2103 = vmatprep.subr.bf16.mxu1 %v2102_v54  ;;  %v2056_v4 = vpack.c.bf16 %v2320_v59, %v2318_v53  ;;  %2341 = vtanh.f32 %v655_v26  ;;  %v671_v28 = vadd.f32 %v2934_v37, %v371_v15  ;;  %v370_v35 = vmul.f32 %v2964_v47, %v3123_v1 }
  0xf6   :  { %v2324_v7 = vpop.eup %2323  ;;  %2343 = vtanh.f32 %v663_v55 }
  0xf7   :  { %v2326_v23 = vpop.eup %2325  ;;  %2057 = vmatpush1.bf16.msra.mxu0 %v2056_v4  ;;  %v2104_v31 = vpack.c.bf16 %v2324_v7, %v2322_v0  ;;  %v3133_v16 = vpop.permute.xlu1 %181  ;;  %2345 = vtanh.f32 %v657_v61  ;;  %v673_v61 = vadd.f32 %v2934_v37, %v373_v20  ;;  %v372_v0 = vmul.f32 %v2983_v56, %v3123_v1 }
  0xf8   :  { %v2328_v18 = vpop.eup %2327  ;;  %2347 = vtanh.f32 %v665_v5  ;;  %v379_v54 = vmul.f32 %v2954_v44, %v3133_v16  ;;  %v381_v55 = vmul.f32 %v2958_v45, %v3133_v16  ;;  %v378_v62 = vmul.f32 %v2964_v47, %v3133_v16 }
  0xf9   :  { %v2330_v50 = vpop.eup %2329  ;;  %2105 = vmatpush1.bf16.msra.mxu1 %v2104_v31  ;;  %v2058_v21 = vpack.c.bf16 %v2328_v18, %v2326_v23  ;;  %2349 = vtanh.f32 %v654_v9  ;;  %v670_v11 = vadd.f32 %v2934_v37, %v370_v35 }
  0xfa   :  { %v2332_v26 = vpop.eup %2331  ;;  %2351 = vtanh.f32 %v662_v17  ;;  %v380_v17 = vmul.f32 %v2983_v56, %v3133_v16 }
  0xfb   :  { %v2334_v51 = vpop.eup %2333  ;;  %2059 = vmatprep.subr.bf16.mxu0 %v2058_v21  ;;  %v2106_v53 = vpack.c.bf16 %v2332_v26, %v2330_v50  ;;  %2353 = vtanh.f32 %v656_v19  ;;  %v672_v19 = vadd.f32 %v2934_v37, %v372_v0 }
  0xfc   :  { %v2336_v58 = vpop.eup %2335  ;;  %v3147_v59 = vpop.permute.xlu1 %535  ;;  %2355 = vtanh.f32 %v664_v22 }
  0xfd   :  { %v2338_v4 = vpop.eup %2337  ;;  %2107 = vmatprep.subr.bf16.mxu1 %v2106_v53  ;;  %v2060_v5 = vpack.c.bf16 %v2336_v58, %v2334_v51  ;;  %v679_v6 = vadd.f32 %v3147_v59, %v379_v54  ;;  %v681_v7 = vadd.f32 %v3147_v59, %v381_v55  ;;  %2357 = vtanh.f32 %v671_v28  ;;  %v3164_v28 = vpop.permute.xlu0 %191 }
  0xfe   :  { %v2340_v9 = vpop.eup %2339  ;;  %v678_v31 = vadd.f32 %v3147_v59, %v378_v62  ;;  %v680_v21 = vadd.f32 %v3147_v59, %v380_v17  ;;  %4807 = vst [vmem:[#allocation36_spill] sm:$0xff] %v3164_v28 }
  0xff   :  { %v2342_v15 = vpop.eup %2341  ;;  %2061 = vmatpush1.bf16.msra.mxu0 %v2060_v5  ;;  %v2108_v23 = vpack.c.bf16 %v2340_v9, %v2338_v4  ;;  %2359 = vtanh.f32 %v679_v6  ;;  %v395_v4 = vmul.f32 %v2954_v44, %v3164_v28  ;;  %v397_v5 = vmul.f32 %v2958_v45, %v3164_v28 }
 0x100   :  { %v2344_v18 = vpop.eup %2343  ;;  %2361 = vtanh.f32 %v673_v61 }
 0x101   :  { %2109 = vmatpush1.bf16.msra.mxu1 %v2108_v23  ;;  %v3161_v20 = vpop.permute.xlu1 %186  ;;  %v2062_v50 = vpack.c.bf16 %v2344_v18, %v2342_v15  ;;  %2363 = vtanh.f32 %v681_v7  ;;  %v2346_v22 = vpop.eup %2345  ;;  %v394_v15 = vmul.f32 %v2964_v47, %v3164_v28  ;;  %v396_v18 = vmul.f32 %v2983_v56, %v3164_v28 }
 0x102   :  { %2365 = vtanh.f32 %v670_v11  ;;  %v2348_v26 = vpop.eup %2347  ;;  %v387_v54 = vmul.f32 %v2954_v44, %v3161_v20  ;;  %v389_v55 = vmul.f32 %v2958_v45, %v3161_v20  ;;  %v386_v58 = vmul.f32 %v2964_v47, %v3161_v20 }
 0x103   :  { %2063 = vmatprep.subr.bf16.mxu0 %v2062_v50  ;;  %2367 = vtanh.f32 %v678_v31  ;;  %v2350_v35 = vpop.eup %2349  ;;  %v2110_v51 = vpack.c.bf16 %v2348_v26, %v2346_v22  ;;  %v388_v6 = vmul.f32 %v2983_v56, %v3161_v20 }
 0x104   :  { %2369 = vtanh.f32 %v672_v19  ;;  %v2352_v53 = vpop.eup %2351 }
 0x105   :  { %2371 = vtanh.f32 %v680_v21  ;;  %v2354_v61 = vpop.eup %2353  ;;  %2111 = vmatprep.subr.bf16.mxu1 %v2110_v51  ;;  %v2064_v62 = vpack.c.bf16 %v2352_v53, %v2350_v35  ;;  %v3188_v21 = vpop.permute.xlu0 %196 }
 0x106   :  { %v3172_v0 = vpop.permute.xlu1 %539  ;;  %v2356_v7 = vpop.eup %2355  ;;  %4808 = vst [vmem:[#allocation37_spill] sm:$0xff] %v3188_v21  ;;  %v403_v51 = vmul.f32 %v2954_v44, %v3188_v21 }
 0x107   :  { %v687_v9 = vadd.f32 %v3172_v0, %v387_v54  ;;  %v689_v11 = vadd.f32 %v3172_v0, %v389_v55  ;;  %v686_v23 = vadd.f32 %v3172_v0, %v386_v58  ;;  %v2358_v31 = vpop.eup %2357  ;;  %2065 = vmatpush1.bf16.msra.mxu0 %v2064_v62  ;;  %v2112_v17 = vpack.c.bf16 %v2356_v7, %v2354_v61 }
 0x108   :  { %v688_v19 = vadd.f32 %v3172_v0, %v388_v6  ;;  %v405_v7 = vmul.f32 %v2958_v45, %v3188_v21 }
 0x109   :  { %v2360_v50 = vpop.eup %2359  ;;  %2373 = vtanh.f32 %v687_v9  ;;  %2113 = vmatpush1.bf16.msra.mxu1 %v2112_v17  ;;  %v3205_v17 = vpop.permute.xlu0 %211 }
 0x10a   :  { %v2362_v22 = vpop.eup %2361  ;;  %v3190_v26 = vpop.permute.xlu1 %543  ;;  %v2066_v35 = vpack.c.bf16 %v2360_v50, %v2358_v31  ;;  %2375 = vtanh.f32 %v689_v11  ;;  %v402_v11 = vmul.f32 %v2964_v47, %v3188_v21  ;;  %4810 = vst [vmem:[#allocation39_spill] sm:$0xff] %v3205_v17 }
 0x10b   :  { %4809 = vst [vmem:[#allocation38_spill] sm:$0xff] %v3190_v26  ;;  %v2364_v53 = vpop.eup %2363  ;;  %v695_v54 = vadd.f32 %v3190_v26, %v395_v4  ;;  %v697_v55 = vadd.f32 %v3190_v26, %v397_v5  ;;  %v694_v58 = vadd.f32 %v3190_v26, %v394_v15  ;;  %2377 = vtanh.f32 %v686_v23 }
 0x10c   :  { %v2366_v61 = vpop.eup %2365  ;;  %2067 = vmatprep.subr.bf16.mxu0 %v2066_v35  ;;  %v2114_v62 = vpack.c.bf16 %v2364_v53, %v2362_v22  ;;  %v696_v6 = vadd.f32 %v3190_v26, %v396_v18  ;;  %2379 = vtanh.f32 %v688_v19  ;;  %v703_v15 = vadd.f32 %v2950_v43, %v403_v51  ;;  %v3216_v35 = vld.sshfl [vmem:[%s4691_s3] sm:$0x33 pattern:$0x76325410] }
 0x10d   :  { %v2368_v9 = vpop.eup %2367  ;;  %2381 = vtanh.f32 %v695_v54  ;;  %v404_v23 = vmul.f32 %v2983_v56, %v3188_v21  ;;  %v3210_v19 = vsub.s32 5, %v2928_v34  ;;  %v705_v22 = vadd.f32 %v2950_v43, %v405_v7  ;;  %4812 = vst [vmem:[#allocation41_spill] sm:$0xff] %v3216_v35 }
 0x10e   :  { %v2370_v4 = vpop.eup %2369  ;;  %2115 = vmatprep.subr.bf16.mxu1 %v2114_v62  ;;  %v2068_v5 = vpack.c.bf16 %v2368_v9, %v2366_v61  ;;  %2383 = vtanh.f32 %v697_v55  ;;  %v702_v51 = vadd.f32 %v2950_v43, %v402_v11  ;;  %v3220_v53 = vsub.s32 4, %v2928_v34 }
 0x10f   :  { %v2372_v31 = vpop.eup %2371  ;;  %v3207_v18 = vpop.permute.xlu1 %201  ;;  %2385 = vtanh.f32 %v694_v58  ;;  %4811 = vst [vmem:[#allocation40_spill] sm:$0xff] %v3210_v19  ;;  %v3223_v54 = vsub.s32 6, %v2928_v34  ;;  %v704_v55 = vadd.f32 %v2950_v43, %v404_v23  ;;  %v3234_v7 = vcombine.high %v3216_v35, %v3216_v35 }
 0x110   :  { %2069 = vmatpush1.bf16.msra.mxu0 %v2068_v5  ;;  %v2116_v50 = vpack.c.bf16 %v2372_v31, %v2370_v4  ;;  %2387 = vtanh.f32 %v696_v6  ;;  %4813 = vst [vmem:[#allocation42_spill] sm:$0xff] %v3220_v53  ;;  %v411_v61 = vmul.f32 %v2954_v44, %v3207_v18  ;;  %v413_v62 = vmul.f32 %v2958_v45, %v3207_v18  ;;  %v3244_v23 = vpop.permute.xlu0 %216 }
 0x111   :  { %4814 = vst [vmem:[#allocation43_spill] sm:$0xff] %v3223_v54  ;;  %2389 = vtanh.f32 %v703_v15  ;;  %v410_v6 = vmul.f32 %v2964_v47, %v3207_v18  ;;  %4815 = vst [vmem:[#allocation44_spill] sm:$0xff] %v3234_v7  ;;  %v3238_v11 = vrot.slane %v2936_v38, %v3210_v19  ;;  %v412_v5 = vmul.f32 %v2983_v56, %v3207_v18 }
 0x112   :  { %2117 = vmatpush1.bf16.msra.mxu1 %v2116_v50  ;;  %2391 = vtanh.f32 %v705_v22  ;;  %4817 = vst [vmem:[#allocation46_spill] sm:$0xff] %v3244_v23  ;;  %2010 = vmatprep.mubr.msk.f32.mxu0 %vm1009_vm0, %v3234_v7  ;;  %v3252_v22 = vsub.s32 7, %v2928_v34  ;;  %v3263_v19 = vrot.slane %v2936_v38, %v3220_v53  ;;  %v426_v26 = vmul.f32 %v2964_v47, %v3205_v17 }
 0x113   :  { %v2374_v58 = vpop.eup %2373  ;;  %4816 = vst [vmem:[#allocation45_spill] sm:$0xff] %v3238_v11  ;;  %2393 = vtanh.f32 %v702_v51  ;;  %2011 = vmatprep.mubr.msk.f32.mxu1 %vm1009_vm0, %v3234_v7  ;;  %v435_v51 = vmul.f32 %v2954_v44, %v3244_v23 }
 0x114   :  { %v2376_v9 = vpop.eup %2375  ;;  %v3240_v4 = vpop.permute.xlu1 %551  ;;  %4818 = vst [vmem:[#allocation47_spill] sm:$0xff] %v3252_v22  ;;  %2395 = vtanh.f32 %v704_v55  ;;  %4819 = vst [vmem:[#allocation48_spill] sm:$0xff] %v3263_v19  ;;  %v3267_v55 = vrot.slane %v2936_v38, %v3223_v54 }
 0x115   :  { %v2378_v15 = vpop.eup %2377  ;;  %v711_v31 = vadd.f32 %v3240_v4, %v411_v61  ;;  %v713_v50 = vadd.f32 %v3240_v4, %v413_v62  ;;  %v710_v8 = vadd.f32 %v3240_v4, %v410_v6  ;;  %v712_v39 = vadd.f32 %v3240_v4, %v412_v5  ;;  %v3306_v21 = vpop.permute.xlu0 %231 }
 0x116   :  { %v2380_v41 = vpop.eup %2379  ;;  %v319_v6 = vmul.f32 %v3238_v11, %v2941_v40  ;;  %4820 = vst [vmem:[#allocation49_spill] sm:$0xff] %v3267_v55  ;;  %v735_v54 = vadd.f32 %v2966_v48, %v435_v51  ;;  %v294_v51 = vmul.f32 %v3263_v19, %v2985_v57  ;;  %4822 = vst [vmem:[#allocation51_spill] sm:$0xff] %v3306_v21 }
 0x117   :  { %v2382_v49 = vpop.eup %2381  ;;  %2397 = vtanh.f32 %v711_v31  ;;  %v3394_v33 = vmul.f32 %v3267_v55, %v3017_v13 }
 0x118   :  { %v2384_v61 = vpop.eup %2383  ;;  %v2070_v62 = vpack.c.bf16 %v2382_v49, %v2374_v58  ;;  %2399 = vtanh.f32 %v713_v50  ;;  %v3273_v58 = vrot.slane %v2936_v38, %v3252_v22  ;;  %v619_v34 = vadd.f32 %v2960_v46, %v319_v6 }
 0x119   :  { %v2386_v42 = vpop.eup %2385  ;;  %v3269_v5 = vpop.permute.xlu1 %206  ;;  %v2118_v31 = vpack.c.bf16 %v2384_v61, %v2376_v9  ;;  %2401 = vtanh.f32 %v710_v8  ;;  %v3279_v9 = vmul.f32 %v3263_v19, %v2941_v40  ;;  %v296_v6 = vmul.f32 %v3267_v55, %v2985_v57 }
 0x11a   :  { %v2388_v49 = vpop.eup %2387  ;;  %4821 = vst [vmem:[#allocation50_spill] sm:$0xff] %v3273_v58  ;;  %2071 = vmatprep.subr.bf16.mxu0 %v2070_v62  ;;  %v2072_v50 = vpack.c.bf16 %v2386_v42, %v2378_v15  ;;  %2403 = vtanh.f32 %v712_v39  ;;  %v419_v8 = vmul.f32 %v2954_v44, %v3269_v5  ;;  %v421_v42 = vmul.f32 %v2958_v45, %v3269_v5 }
 0x11b   :  { %2119 = vmatprep.subr.bf16.mxu1 %v2118_v31  ;;  %v2120_v53 = vpack.c.bf16 %v2388_v49, %v2380_v41  ;;  %v2390_v43 = vpop.eup %2389  ;;  %v3287_v15 = vmul.f32 %v3267_v55, %v2941_v40  ;;  %v418_v61 = vmul.f32 %v2964_v47, %v3269_v5  ;;  %2405 = vtanh.f32 %v619_v34 }
 0x11c   :  { %2073 = vmatpush1.bf16.msra.mxu0 %v2072_v50  ;;  %v2392_v39 = vpop.eup %2391  ;;  %v427_v22 = vmul.f32 %v2954_v44, %v3205_v17  ;;  %v429_v34 = vmul.f32 %v2958_v45, %v3205_v17  ;;  %2407 = vtanh.f32 %v735_v54  ;;  %v420_v54 = vmul.f32 %v2983_v56, %v3269_v5 }
 0x11d   :  { %2121 = vmatpush1.bf16.msra.mxu1 %v2120_v53  ;;  %v321_v53 = vmul.f32 %v3273_v58, %v2941_v40  ;;  %v2394_v62 = vpop.eup %2393 }
 0x11e   :  { %v3289_v41 = vpop.permute.xlu1 %555  ;;  %v2396_v50 = vpop.eup %2395 }
 0x11f   :  { %v719_v31 = vadd.f32 %v3289_v41, %v419_v8  ;;  %v721_v49 = vadd.f32 %v3289_v41, %v421_v42  ;;  %v718_v40 = vadd.f32 %v3289_v41, %v418_v61  ;;  %v428_v8 = vmul.f32 %v2983_v56, %v3205_v17 }
 0x120   :  { %v437_v42 = vmul.f32 %v2958_v45, %v3244_v23  ;;  %v434_v61 = vmul.f32 %v2964_v47, %v3244_v23 }
 0x121   :  { %v2398_v38 = vpop.eup %2397  ;;  %2409 = vtanh.f32 %v719_v31 }
 0x122   :  { %v2400_v28 = vpop.eup %2399  ;;  %v3314_v37 = vpop.permute.xlu1 %559  ;;  %v2074_v1 = vpack.c.bf16 %v2398_v38, %v2390_v43  ;;  %2411 = vtanh.f32 %v721_v49  ;;  %v720_v38 = vadd.f32 %v3289_v41, %v420_v54  ;;  %v436_v43 = vmul.f32 %v2983_v56, %v3244_v23 }
 0x123   :  { %4823 = vst [vmem:[#allocation52_spill] sm:$0xff] %v3314_v37  ;;  %v2402_v31 = vpop.eup %2401  ;;  %v2122_v36 = vpack.c.bf16 %v2400_v28, %v2392_v39  ;;  %v727_v14 = vadd.f32 %v3314_v37, %v427_v22  ;;  %v729_v17 = vadd.f32 %v3314_v37, %v429_v34  ;;  %v726_v27 = vadd.f32 %v3314_v37, %v426_v26 }
 0x124   :  { %v2404_v12 = vpop.eup %2403  ;;  %2075 = vmatprep.subr.bf16.mxu0 %v2074_v1  ;;  %v2076_v3 = vpack.c.bf16 %v2402_v31, %v2394_v62  ;;  %2413 = vtanh.f32 %v718_v40  ;;  %v728_v28 = vadd.f32 %v3314_v37, %v428_v8  ;;  %v295_v22 = vmul.f32 %v3238_v11, %v2985_v57 }
 0x125   :  { %2123 = vmatprep.subr.bf16.mxu1 %v2122_v36  ;;  %v2124_v49 = vpack.c.bf16 %v2404_v12, %v2396_v50  ;;  %2415 = vtanh.f32 %v727_v14  ;;  %v737_v26 = vadd.f32 %v2966_v48, %v437_v42  ;;  %v303_v1 = vmul.f32 %v3238_v11, %v3000_v2  ;;  %v3343_v14 = vpop.permute.xlu0 %236  ;;  %v3348_v62 = vpop.eup %2405 }
 0x126   :  { %2077 = vmatpush1.bf16.msra.mxu0 %v2076_v3  ;;  %2417 = vtanh.f32 %v729_v17  ;;  %v3333_v39 = vadd.f32 %v2960_v46, %v321_v53  ;;  %v3337_v36 = vmul.f32 %v3263_v19, %v2975_v52  ;;  %v3341_v12 = vmul.f32 %v3267_v55, %v2975_v52  ;;  %4826 = vst [vmem:[#allocation55_spill] sm:$0xff] %v3343_v14  ;;  %v3362_v42 = vpop.eup %2407 }
 0x127   :  { %2125 = vmatpush1.bf16.msra.mxu1 %v2124_v49  ;;  %v3345_v3 = vpop.permute.xlu1 %221  ;;  %2419 = vtanh.f32 %v726_v27  ;;  %v734_v17 = vadd.f32 %v2966_v48, %v434_v61  ;;  %v736_v53 = vadd.f32 %v2966_v48, %v436_v43  ;;  %v297_v50 = vmul.f32 %v3273_v58, %v2985_v57 }
 0x128   :  { %4824 = vst [vmem:[#allocation53_spill] sm:$0xff] %v3337_v36  ;;  %4825 = vst [vmem:[#allocation54_spill] sm:$0xff] %v3341_v12  ;;  %2421 = vtanh.f32 %v720_v38  ;;  %v3354_v34 = vadd.f32 %v2919_v29, %v294_v51  ;;  %v302_v40 = vmul.f32 %v3263_v19, %v3000_v2  ;;  %v595_v8 = vadd.f32 %v2919_v29, %v295_v22 }
 0x129   :  { %2423 = vtanh.f32 %v728_v28  ;;  %v3360_v27 = vadd.f32 %v2919_v29, %v296_v6  ;;  %v3366_v54 = vmul.f32 %v3267_v55, %v3000_v2  ;;  %v3370_v57 = vmul.f32 %v3263_v19, %v3017_v13 }
 0x12a   :  { %2425 = vtanh.f32 %v737_v26  ;;  %v603_v51 = vadd.f32 %v2924_v32, %v303_v1  ;;  %v443_v31 = vmul.f32 %v2954_v44, %v3345_v3  ;;  %v445_v6 = vmul.f32 %v2958_v45, %v3345_v3  ;;  %v3387_v1 = vpop.permute.xlu0 %579 }
 0x12b   :  { %v2410_v61 = vpop.eup %2409  ;;  %v442_v38 = vmul.f32 %v2964_v47, %v3345_v3  ;;  %2427 = vtanh.f32 %v734_v17  ;;  %v444_v28 = vmul.f32 %v2983_v56, %v3345_v3  ;;  %v467_v22 = vmul.f32 %v2954_v44, %v3343_v14  ;;  %4827 = vst [vmem:[#allocation56_spill] sm:$0xff] %v3387_v1 }
 0x12c   :  { %v2412_v43 = vpop.eup %2411  ;;  %v3379_v49 = vpop.permute.xlu1 %567  ;;  %2429 = vtanh.f32 %v736_v53  ;;  %v305_v26 = vmul.f32 %v3273_v58, %v3000_v2  ;;  %v382_v53 = vmul.f32 %v3263_v19, %v3133_v16  ;;  %v461_v36 = vmul.f32 %v2958_v45, %v3306_v21 }
 0x12d   :  { %v743_v48 = vadd.f32 %v3379_v49, %v443_v31  ;;  %v745_v23 = vadd.f32 %v3379_v49, %v445_v6  ;;  %v742_v17 = vadd.f32 %v3379_v49, %v442_v38  ;;  %2431 = vtanh.f32 %v595_v8 }
 0x12e   :  { %v2414_v37 = vpop.eup %2413  ;;  %v744_v25 = vadd.f32 %v3379_v49, %v444_v28  ;;  %2433 = vtanh.f32 %v603_v51  ;;  %v384_v31 = vmul.f32 %v3267_v55, %v3133_v16  ;;  %v3403_v6 = vmul.f32 %v3263_v19, %v3161_v20 }
 0x12f   :  { %v2416_v2 = vpop.eup %2415  ;;  %v3407_v8 = vmul.f32 %v3267_v55, %v3161_v20  ;;  %2435 = vtanh.f32 %v743_v48  ;;  %v459_v28 = vmul.f32 %v2954_v44, %v3306_v21  ;;  %v767_v51 = vadd.f32 %v3387_v1, %v467_v22 }
 0x130   :  { %v2418_v38 = vpop.eup %2417  ;;  %v2078_v12 = vpack.c.bf16 %v2416_v2, %v2410_v61  ;;  %2437 = vtanh.f32 %v745_v23  ;;  %v605_v10 = vadd.f32 %v2924_v32, %v305_v26  ;;  %v597_v23 = vadd.f32 %v2919_v29, %v297_v50 }
 0x131   :  { %v2420_v7 = vpop.eup %2419  ;;  %v3412_v60 = vpop.permute.xlu1 %226  ;;  %v2126_v35 = vpack.c.bf16 %v2418_v38, %v2412_v43  ;;  %2439 = vtanh.f32 %v742_v17  ;;  %v383_v61 = vmul.f32 %v3238_v11, %v3133_v16  ;;  %v458_v43 = vmul.f32 %v2964_v47, %v3306_v21 }
 0x132   :  { %v2422_v63 = vpop.eup %2421  ;;  %2079 = vmatprep.subr.bf16.mxu0 %v2078_v12  ;;  %v2080_v48 = vpack.c.bf16 %v2420_v7, %v2414_v37  ;;  %2441 = vtanh.f32 %v744_v25  ;;  %v460_v17 = vmul.f32 %v2983_v56, %v3306_v21  ;;  %v3426_v26 = vmul.f32 %v2958_v45, %v3343_v14 }
 0x133   :  { %v2424_v22 = vpop.eup %2423  ;;  %2127 = vmatprep.subr.bf16.mxu1 %v2126_v35  ;;  %v3430_v37 = vmul.f32 %v2964_v47, %v3343_v14  ;;  %2443 = vtanh.f32 %v767_v51  ;;  %v602_v35 = vadd.f32 %v2924_v32, %v302_v40  ;;  %v3434_v7 = vadd.f32 %v3147_v59, %v383_v61 }
 0x134   :  { %v2426_v29 = vpop.eup %2425  ;;  %2081 = vmatpush1.bf16.msra.mxu0 %v2080_v48  ;;  %v2128_v25 = vpack.c.bf16 %v2424_v22, %v2422_v63  ;;  %v451_v50 = vmul.f32 %v2954_v44, %v3412_v60  ;;  %v453_v2 = vmul.f32 %v2958_v45, %v3412_v60  ;;  %v450_v38 = vmul.f32 %v2964_v47, %v3412_v60 }
 0x135   :  { %4828 = vst [vmem:[#allocation57_spill] sm:$0xff] %v3434_v7  ;;  %v2428_v12 = vpop.eup %2427  ;;  %2445 = vtanh.f32 %v605_v10  ;;  %v385_v40 = vmul.f32 %v3273_v58, %v3133_v16  ;;  %v3447_v51 = vadd.f32 %v3147_v59, %v382_v53  ;;  %v3450_v48 = vadd.f32 %v3147_v59, %v384_v31 }
 0x136   :  { %v2430_v21 = vpop.eup %2429  ;;  %2129 = vmatpush1.bf16.msra.mxu1 %v2128_v25  ;;  %v3442_v63 = vpop.permute.xlu1 %571  ;;  %2447 = vtanh.f32 %v597_v23  ;;  %v468_v25 = vmul.f32 %v2983_v56, %v3343_v14  ;;  %v391_v31 = vmul.f32 %v3238_v11, %v3161_v20 }
 0x137   :  { %4829 = vst [vmem:[#allocation58_spill] sm:$0xff] %v3447_v51  ;;  %4830 = vst [vmem:[#allocation59_spill] sm:$0xff] %v3450_v48  ;;  %v3452_v61 = vpop.eup %2431  ;;  %v751_v22 = vadd.f32 %v3442_v63, %v451_v50  ;;  %v753_v10 = vadd.f32 %v3442_v63, %v453_v2  ;;  %2449 = vtanh.f32 %v3354_v34  ;;  %v750_v16 = vadd.f32 %v3442_v63, %v450_v38 }
 0x138   :  { %4831 = vst [vmem:[#allocation60_spill] sm:$0xff] %v3452_v61  ;;  %v3459_v23 = vpop.eup %2433  ;;  %2451 = vtanh.f32 %v602_v35  ;;  %v3463_v53 = vadd.f32 %v3147_v59, %v385_v40  ;;  %v452_v50 = vmul.f32 %v2983_v56, %v3412_v60  ;;  %v311_v34 = vmul.f32 %v3238_v11, %v3017_v13 }
 0x139   :  { %4832 = vst [vmem:[#allocation61_spill] sm:$0xff] %v3459_v23  ;;  %v2436_v48 = vpop.eup %2435  ;;  %2453 = vtanh.f32 %v751_v22  ;;  %v3477_v35 = vadd.f32 %v3172_v0, %v391_v31  ;;  %v393_v40 = vmul.f32 %v3273_v58, %v3161_v20 }
 0x13a   :  { %4833 = vst [vmem:[#allocation62_spill] sm:$0xff] %v3463_v53  ;;  %v2438_v14 = vpop.eup %2437  ;;  %v3473_v38 = vpop.permute.xlu1 %575  ;;  %v2082_v59 = vpack.c.bf16 %v2436_v48, %v3362_v42  ;;  %2455 = vtanh.f32 %v753_v10  ;;  %v752_v42 = vadd.f32 %v3442_v63, %v452_v50 }
 0x13b   :  { %4834 = vst [vmem:[#allocation63_spill] sm:$0xff] %v3473_v38  ;;  %v2440_v22 = vpop.eup %2439  ;;  %v2130_v51 = vpack.c.bf16 %v2438_v14, %v2426_v29  ;;  %v759_v53 = vadd.f32 %v3473_v38, %v459_v28  ;;  %v761_v2 = vadd.f32 %v3473_v38, %v461_v36  ;;  %v758_v7 = vadd.f32 %v3473_v38, %v458_v43 }
 0x13c   :  { %v2442_v61 = vpop.eup %2441  ;;  %2083 = vmatprep.subr.bf16.mxu0 %v2082_v59  ;;  %v2084_v23 = vpack.c.bf16 %v2440_v22, %v2428_v12  ;;  %2457 = vtanh.f32 %v750_v16  ;;  %v3486_v48 = vadd.f32 %v3172_v0, %v393_v40  ;;  %v760_v20 = vadd.f32 %v3473_v38, %v460_v17 }
 0x13d   :  { %2131 = vmatprep.subr.bf16.mxu1 %v2130_v51  ;;  %v2132_v10 = vpack.c.bf16 %v2442_v61, %v2430_v21  ;;  %2459 = vtanh.f32 %v759_v53  ;;  %v3491_v14 = vadd.f32 %v3172_v0, %v3403_v6  ;;  %v3493_v36 = vpop.eup %2443  ;;  %v3497_v28 = vmul.f32 %v3263_v19, %v3034_v24 }
 0x13e   :  { %v3501_v43 = vmul.f32 %v3267_v55, %v3034_v24  ;;  %2085 = vmatpush1.bf16.msra.mxu0 %v2084_v23  ;;  %2461 = vtanh.f32 %v761_v2  ;;  %v3505_v21 = vadd.f32 %v3172_v0, %v3407_v8  ;;  %v414_v6 = vmul.f32 %v3263_v19, %v3207_v18 }
 0x13f   :  { %v3507_v17 = vpop.eup %2445  ;;  %v416_v29 = vmul.f32 %v3267_v55, %v3207_v18  ;;  %2133 = vmatpush1.bf16.msra.mxu1 %v2132_v10  ;;  %v3513_v12 = vpop.permute.xlu1 %241  ;;  %2463 = vtanh.f32 %v758_v7  ;;  %v604_v51 = vadd.f32 %v2924_v32, %v3366_v54  ;;  %v769_v0 = vadd.f32 %v3387_v1, %v3426_v26 }
 0x140   :  { %v3517_v61 = vpop.eup %2447  ;;  %2465 = vtanh.f32 %v752_v42  ;;  %v611_v8 = vadd.f32 %v2921_v30, %v311_v34  ;;  %v415_v23 = vmul.f32 %v3238_v11, %v3207_v18  ;;  %v766_v7 = vadd.f32 %v3387_v1, %v3430_v37 }
 0x141   :  { %v3524_v16 = vpop.eup %2449  ;;  %2467 = vtanh.f32 %v760_v20  ;;  %v3529_v53 = vadd.f32 %v3387_v1, %v468_v25  ;;  %v313_v32 = vmul.f32 %v3273_v58, %v3017_v13  ;;  %v475_v26 = vmul.f32 %v2954_v44, %v3513_v12 }
 0x142   :  { %v3533_v54 = vpop.eup %2451  ;;  %2469 = vtanh.f32 %v3360_v27  ;;  %v3541_v50 = vadd.f32 %v3240_v4, %v415_v23  ;;  %v477_v25 = vmul.f32 %v2958_v45, %v3513_v12  ;;  %v474_v13 = vmul.f32 %v2964_v47, %v3513_v12 }
 0x143   :  { %v2454_v37 = vpop.eup %2453  ;;  %2471 = vtanh.f32 %v604_v51  ;;  %v422_v59 = vmul.f32 %v3263_v19, %v3269_v5  ;;  %v417_v27 = vmul.f32 %v3273_v58, %v3207_v18  ;;  %v3556_v22 = vadd.f32 %v3240_v4, %v414_v6 }
 0x144   :  { %v2456_v34 = vpop.eup %2455  ;;  %v3551_v40 = vpop.permute.xlu1 %583  ;;  %2473 = vtanh.f32 %v611_v8  ;;  %v3565_v8 = vadd.f32 %v3240_v4, %v416_v29  ;;  %v423_v18 = vmul.f32 %v3238_v11, %v3269_v5 }
 0x145   :  { %v775_v42 = vadd.f32 %v3551_v40, %v475_v26  ;;  %v777_v10 = vadd.f32 %v3551_v40, %v477_v25  ;;  %2475 = vtanh.f32 %v769_v0  ;;  %v774_v20 = vadd.f32 %v3551_v40, %v474_v13 }
 0x146   :  { %v2458_v51 = vpop.eup %2457  ;;  %2477 = vtanh.f32 %v766_v7  ;;  %v3562_v23 = vadd.f32 %v3240_v4, %v417_v27  ;;  %4835 = vst [vmem:[#allocation64_spill] sm:$0xff] %v3565_v8  ;;  %v424_v26 = vmul.f32 %v3267_v55, %v3269_v5  ;;  %v3573_v0 = vadd.f32 %v2921_v30, %v3370_v57 }
 0x147   :  { %v2460_v6 = vpop.eup %2459  ;;  %2479 = vtanh.f32 %v775_v42  ;;  %v425_v7 = vmul.f32 %v3273_v58, %v3269_v5  ;;  %v3578_v4 = vadd.f32 %v3289_v41, %v423_v18  ;;  %v3581_v29 = vadd.f32 %v3289_v41, %v422_v59 }
 0x148   :  { %v2462_v25 = vpop.eup %2461  ;;  %v2086_v13 = vpack.c.bf16 %v2460_v6, %v2454_v37  ;;  %2481 = vtanh.f32 %v777_v10  ;;  %v613_v42 = vadd.f32 %v2921_v30, %v313_v32  ;;  %v3591_v10 = vadd.f32 %v2960_v46, %v3279_v9 }
 0x149   :  { %4836 = vst [vmem:[#allocation65_spill] sm:$0xff] %v3578_v4  ;;  %4837 = vst [vmem:[#allocation66_spill] sm:$0xff] %v3581_v29  ;;  %v2464_v27 = vpop.eup %2463  ;;  %v247_v31 = vpop.permute.xlu1 %246  ;;  %v2134_v2 = vpack.c.bf16 %v2462_v25, %v2456_v34  ;;  %2483 = vtanh.f32 %v774_v20  ;;  %v3585_v57 = vadd.f32 %v3289_v41, %v425_v7  ;;  %v3595_v59 = vadd.f32 %v2921_v30, %v3394_v33 }
 0x14a   :  { %v2466_v1 = vpop.eup %2465  ;;  %v482_v5 = vmul.f32 %v2964_v47, %v247_v31  ;;  %v483_v37 = vmul.f32 %v2954_v44, %v247_v31  ;;  %2087 = vmatprep.subr.bf16.mxu0 %v2086_v13  ;;  %v588_v20 = vpop.permute.xlu0 %587  ;;  %v486_v32 = vmul.f32 %v3263_v19, %v247_v31  ;;  %v487_v18 = vmul.f32 %v3238_v11, %v247_v31 }
 0x14b   :  { %4838 = vst [vmem:[#allocation67_spill] sm:$0xff] %v3585_v57  ;;  %v2468_v34 = vpop.eup %2467  ;;  %v488_v6 = vmul.f32 %v3267_v55, %v247_v31  ;;  %v489_v7 = vmul.f32 %v3273_v58, %v247_v31  ;;  %2135 = vmatprep.subr.bf16.mxu1 %v2134_v2  ;;  %v484_v9 = vmul.f32 %v2983_v56, %v247_v31 }
 0x14c   :  { %v3601_v25 = vpop.eup %2469  ;;  %v485_v13 = vmul.f32 %v2958_v45, %v247_v31  ;;  %v782_v44 = vadd.f32 %v588_v20, %v482_v5  ;;  %v783_v30 = vadd.f32 %v588_v20, %v483_v37  ;;  %v3607_v47 = vadd.f32 %v588_v20, %v486_v32 }
 0x14d   :  { %v3605_v33 = vpop.eup %2471  ;;  %v3609_v38 = vadd.f32 %v588_v20, %v487_v18  ;;  %v3611_v29 = vadd.f32 %v588_v20, %v488_v6  ;;  %v3613_v57 = vadd.f32 %v588_v20, %v489_v7  ;;  %v2088_v2 = vpack.c.bf16 %v2464_v27, %v2458_v51 }
 0x14e   :  { %v3615_v4 = vpop.eup %2473  ;;  %2485 = vtanh.f32 %v782_v44  ;;  %v2136_v8 = vpack.c.bf16 %v2468_v34, %v2466_v1  ;;  %v620_v32 = vadd.f32 %v2960_v46, %v3287_v15  ;;  %v327_v18 = vmul.f32 %v3238_v11, %v2975_v52 }
 0x14f   :  { %v2476_v5 = vpop.eup %2475  ;;  %2487 = vtanh.f32 %v783_v30  ;;  %v2146_v37 = vpack.c.bf16 %v3348_v62, %v3615_v4  ;;  %v784_v7 = vadd.f32 %v588_v20, %v484_v9  ;;  %2089 = vmatpush1.bf16.msra.mxu0 %v2088_v2  ;;  %v476_v44 = vmul.f32 %v2983_v56, %v3513_v12  ;;  %v4851_v4 = vld [vmem:[#allocation14_spill] sm:$0xff] }
 0x150   :  { %v2478_v6 = vpop.eup %2477  ;;  %2137 = vmatpush1.bf16.msra.mxu1 %v2136_v8  ;;  %v3628_v1 = vadd.f32 %v3289_v41, %v424_v26  ;;  %v446_v27 = vmul.f32 %v3263_v19, %v3345_v3  ;;  %v785_v34 = vadd.f32 %v588_v20, %v485_v13  ;;  %v335_v46 = vmul.f32 %v3238_v11, %v3034_v24 }
 0x151   :  { %v2480_v51 = vpop.eup %2479  ;;  %v447_v15 = vmul.f32 %v3238_v11, %v3345_v3  ;;  %v776_v30 = vadd.f32 %v3551_v40, %v476_v44  ;;  %2489 = vtanh.f32 %v3529_v53  ;;  %v449_v41 = vmul.f32 %v3273_v58, %v3345_v3 }
 0x152   :  { %v2482_v9 = vpop.eup %2481  ;;  %v2090_v8 = vpack.c.bf16 %v2480_v51, %v3493_v36  ;;  %v448_v20 = vmul.f32 %v3267_v55, %v3345_v3  ;;  %2491 = vtanh.f32 %v613_v42  ;;  %v3650_v53 = vadd.f32 %v3379_v49, %v446_v27 }
 0x153   :  { %v2484_v26 = vpop.eup %2483  ;;  %v2138_v13 = vpack.c.bf16 %v2482_v9, %v2476_v5  ;;  %v3644_v2 = vadd.f32 %v3379_v49, %v447_v15  ;;  %2493 = vtanh.f32 %v784_v7  ;;  %v3647_v36 = vadd.f32 %v3379_v49, %v449_v41 }
 0x154   :  { %2091 = vmatprep.subr.bf16.mxu0 %v2090_v8  ;;  %v2092_v31 = vpack.c.bf16 %v2484_v26, %v2478_v6  ;;  %v454_v44 = vmul.f32 %v3263_v19, %v3412_v60  ;;  %2495 = vtanh.f32 %v785_v34  ;;  %v3655_v3 = vadd.f32 %v3379_v49, %v448_v20  ;;  %v4842_v20 = vld [vmem:[#allocation41_spill] sm:$0xff] }
 0x155   :  { %2139 = vmatprep.subr.bf16.mxu1 %v2138_v13  ;;  %v455_v42 = vmul.f32 %v3238_v11, %v3412_v60  ;;  %2497 = vtanh.f32 %v776_v30  ;;  %v329_v5 = vmul.f32 %v3273_v58, %v2975_v52  ;;  %v337_v6 = vmul.f32 %v3273_v58, %v3034_v24  ;;  %v4839_v52 = vld [vmem:[#allocation26_spill] sm:$0xff]  ;;  %v4840_v24 = vld [vmem:[#allocation27_spill] sm:$0xff]  ;;  %v4843_v13 = vld [vmem:[#allocation61_spill] sm:$0xff] }
 0x156   :  { %2093 = vmatpush1.bf16.msra.mxu0 %v2092_v31  ;;  %v457_v7 = vmul.f32 %v3273_v58, %v3412_v60  ;;  %v456_v51 = vmul.f32 %v3267_v55, %v3412_v60  ;;  %2499 = vtanh.f32 %v3333_v39  ;;  %v3672_v31 = vadd.f32 %v3442_v63, %v454_v44  ;;  %v4844_v44 = vld [vmem:[#allocation60_spill] sm:$0xff] }
 0x157   :  { %v3669_v49 = vadd.f32 %v3442_v63, %v455_v42  ;;  %2501 = vtanh.f32 %v3573_v0  ;;  %v627_v34 = vadd.f32 %v4839_v52, %v327_v18  ;;  %v635_v15 = vadd.f32 %v4840_v24, %v335_v46  ;;  %v4841_v0 = vld [vmem:[#allocation53_spill] sm:$0xff] }
 0x158   :  { %v2486_v27 = vpop.eup %2485  ;;  %v3678_v9 = vadd.f32 %v3442_v63, %v457_v7  ;;  %v478_v60 = vmul.f32 %v3263_v19, %v3513_v12  ;;  %2503 = vtanh.f32 %v3591_v10  ;;  %v629_v39 = vadd.f32 %v4839_v52, %v329_v5  ;;  %v4846_v5 = vld [vmem:[#allocation29_spill] sm:$0xff] }
 0x159   :  { %v2488_v8 = vpop.eup %2487  ;;  %v3685_v30 = vadd.f32 %v3442_v63, %v456_v51  ;;  %2505 = vtanh.f32 %v3595_v59  ;;  %v626_v18 = vadd.f32 %v4839_v52, %v4841_v0  ;;  %v479_v46 = vmul.f32 %v3238_v11, %v3513_v12  ;;  %v4849_v0 = vld [vmem:[#allocation54_spill] sm:$0xff] }
 0x15a   :  { %1060 = vmatprep.subr.mxu0 %v2488_v8  ;;  %v481_v41 = vmul.f32 %v3273_v58, %v3513_v12  ;;  %v480_v10 = vmul.f32 %v3267_v55, %v3513_v12  ;;  %2507 = vtanh.f32 %v620_v32  ;;  %v637_v63 = vadd.f32 %v4840_v24, %v337_v6  ;;  %v4848_v8 = vld [vmem:[#allocation44_spill] sm:$0xff] }
 0x15b   :  { %1061 = vmatpush1.msra.mxu0 %v2486_v27  ;;  %v3698_v26 = vadd.f32 %v3551_v40, %v478_v60  ;;  %v2490_v59 = vpop.eup %2489  ;;  %v4845_v42 = vpack.c.bf16 %v4843_v13, %v4844_v44  ;;  %2509 = vtanh.f32 %v627_v34  ;;  %v343_v7 = vmul.f32 %v3238_v11, %v4846_v5 }
 0x15c   :  { %1077 = vmatmul.mubr.f32.vlgmr.msra.gmra.mrb[0].mxu0 %v4842_v20  ;;  %v3707_v12 = vadd.f32 %v3551_v40, %v479_v46  ;;  %v3710_v32 = vadd.f32 %v3551_v40, %v481_v41  ;;  %v3712_v6 = vpop.eup %2491  ;;  %v4847_v51 = vpack.c.bf16 %v3533_v54, %v3524_v16  ;;  %2511 = vtanh.f32 %v635_v15 }
 0x15d   :  { %2143 = vmatprep.subr.bf16.mxu0 %v4845_v42  ;;  %v634_v27 = vadd.f32 %v4840_v24, %v3497_v28  ;;  %v3720_v34 = vadd.f32 %v3551_v40, %v480_v10  ;;  %2012 = vmatprep.mubr.msk.f32.mxu0 %vm1009_vm0, %v4848_v8  ;;  %v2494_v60 = vpop.eup %2493  ;;  %2513 = vtanh.f32 %v629_v39  ;;  %v628_v16 = vadd.f32 %v4839_v52, %v4849_v0  ;;  %v4850_v40 = vld [vmem:[#allocation28_spill] sm:$0xff]  ;;  %v4852_v10 = vld [vmem:[#allocation30_spill] sm:$0xff] }
 0x15e   :  { %2145 = vmatpush1.bf16.msra.mxu0 %v4847_v51  ;;  %v345_v54 = vmul.f32 %v3273_v58, %v4846_v5  ;;  %v2496_v15 = vpop.eup %2495  ;;  %2515 = vtanh.f32 %v637_v63  ;;  %v636_v28 = vadd.f32 %v4840_v24, %v3501_v43  ;;  %v351_v46 = vmul.f32 %v3238_v11, %v4850_v40 }
 0x15f   :  { %2147 = vmatprep.subr.bf16.mxu0 %v2146_v37  ;;  %v2498_v41 = vpop.eup %2497  ;;  %v342_v62 = vmul.f32 %v3263_v19, %v4846_v5  ;;  %2517 = vtanh.f32 %v626_v18  ;;  %v643_v37 = vadd.f32 %v4851_v4, %v343_v7  ;;  %v353_v63 = vmul.f32 %v3273_v58, %v4850_v40 }
 0x160   :  { %v2500_v39 = vpop.eup %2499  ;;  %v2140_v52 = vpack.c.bf16 %v2498_v41, %v2490_v59  ;;  %2519 = vtanh.f32 %v634_v27  ;;  %v651_v13 = vadd.f32 %v4852_v10, %v351_v46  ;;  %v344_v43 = vmul.f32 %v3267_v55, %v4846_v5 }
 0x161   :  { %v2502_v44 = vpop.eup %2501  ;;  %v2194_v24 = vpack.c.bf16 %v2500_v39, %v3712_v6  ;;  %2521 = vtanh.f32 %v628_v16  ;;  %v645_v42 = vadd.f32 %v4851_v4, %v345_v54  ;;  %v350_v7 = vmul.f32 %v3263_v19, %v4850_v40  ;;  %v4853_v54 = vld [vmem:[#allocation32_spill] sm:$0xff]  ;;  %v4854_v39 = vld [vmem:[#allocation31_spill] sm:$0xff] }
 0x162   :  { %v2504_v18 = vpop.eup %2503  ;;  %2141 = vmatpush1.bf16.msra.mxu1 %v2140_v52  ;;  %2523 = vtanh.f32 %v636_v28  ;;  %v653_v59 = vadd.f32 %v4852_v10, %v353_v63  ;;  %v642_v0 = vadd.f32 %v4851_v4, %v342_v62  ;;  %v352_v6 = vmul.f32 %v3267_v55, %v4850_v40 }
 0x163   :  { %v2506_v51 = vpop.eup %2505  ;;  %1131 = vmatprep.subr.mxu1 %v2496_v15  ;;  %v2148_v27 = vpack.c.bf16 %v2504_v18, %v2502_v44  ;;  %2525 = vtanh.f32 %v643_v37  ;;  %v650_v16 = vadd.f32 %v4852_v10, %v350_v7  ;;  %v367_v46 = vmul.f32 %v3238_v11, %v4853_v54 }
 0x164   :  { %v2508_v5 = vpop.eup %2507  ;;  %2527 = vtanh.f32 %v651_v13  ;;  %v644_v15 = vadd.f32 %v4851_v4, %v344_v43  ;;  %v359_v37 = vmul.f32 %v3238_v11, %v4854_v39  ;;  %v652_v40 = vadd.f32 %v4852_v10, %v352_v6  ;;  %v4856_v4 = vld [vmem:[#allocation33_spill] sm:$0xff] }
 0x165   :  { %v2510_v41 = vpop.eup %2509  ;;  %2149 = vmatpush1.bf16.msra.mxu0 %v2148_v27  ;;  %v2196_v28 = vpack.c.bf16 %v2508_v5, %v2506_v51  ;;  %2529 = vtanh.f32 %v645_v42  ;;  %v369_v52 = vmul.f32 %v3273_v58, %v4853_v54  ;;  %v4855_v63 = vpack.c.bf16 %v3507_v17, %v3517_v61  ;;  %v4858_v17 = vld [vmem:[#allocation34_spill] sm:$0xff] }
 0x166   :  { %v2512_v62 = vpop.eup %2511  ;;  %1132 = vmatpush1.msra.mxu1 %v2494_v60  ;;  %2531 = vtanh.f32 %v653_v59  ;;  %v659_v43 = vadd.f32 %v4856_v4, %v359_v37  ;;  %v361_v60 = vmul.f32 %v3273_v58, %v4854_v39  ;;  %v366_v10 = vmul.f32 %v3263_v19, %v4853_v54 }
 0x167   :  { %v2514_v13 = vpop.eup %2513  ;;  %1148 = vmatmul.mubr.f32.vlgmr.msra.gmra.mrb[0].mxu1 %v4842_v20  ;;  %2191 = vmatprep.subr.bf16.mxu1 %v4855_v63  ;;  %v2150_v44 = vpack.c.bf16 %v2512_v62, %v2510_v41  ;;  %2533 = vtanh.f32 %v642_v0  ;;  %v358_v18 = vmul.f32 %v3263_v19, %v4854_v39  ;;  %v4857_v20 = vpack.c.bf16 %v3605_v33, %v3601_v25  ;;  %v4860_v63 = vld [vmem:[#allocation16_spill] sm:$0xff] }
 0x168   :  { %v2516_v42 = vpop.eup %2515  ;;  %2535 = vtanh.f32 %v650_v16  ;;  %v667_v61 = vadd.f32 %v4858_v17, %v367_v46  ;;  %2013 = vmatprep.mubr.msk.f32.mxu1 %vm1009_vm0, %v4848_v8  ;;  %v368_v59 = vmul.f32 %v3267_v55, %v4853_v54  ;;  %v661_v51 = vadd.f32 %v4856_v4, %v361_v60  ;;  %v4859_v16 = vld [vmem:[#allocation35_spill] sm:$0xff] }
 0x169   :  { %2193 = vmatpush1.bf16.msra.mxu1 %v4857_v20  ;;  %v2518_v7 = vpop.eup %2517  ;;  %2151 = vmatprep.subr.bf16.mxu0 %v2150_v44  ;;  %2537 = vtanh.f32 %v644_v15  ;;  %v360_v25 = vmul.f32 %v3267_v55, %v4854_v39  ;;  %v669_v33 = vadd.f32 %v4858_v17, %v369_v52  ;;  %v658_v0 = vadd.f32 %v4856_v4, %v358_v18 }
 0x16a   :  { %2195 = vmatprep.subr.bf16.mxu1 %v2194_v24  ;;  %v2520_v27 = vpop.eup %2519  ;;  %2539 = vtanh.f32 %v652_v40  ;;  %v2198_v8 = vpack.c.bf16 %v2516_v42, %v2514_v13  ;;  %v375_v24 = vmul.f32 %v3238_v11, %v4859_v16  ;;  %v666_v46 = vadd.f32 %v4858_v17, %v366_v10 }
 0x16b   :  { %v2522_v5 = vpop.eup %2521  ;;  %v2152_v6 = vpack.c.bf16 %v2520_v27, %v2518_v7  ;;  %2541 = vtanh.f32 %v659_v43  ;;  %v660_v15 = vadd.f32 %v4856_v4, %v360_v25  ;;  %v377_v39 = vmul.f32 %v3273_v58, %v4859_v16 }
 0x16c   :  { %v2524_v54 = vpop.eup %2523  ;;  %2543 = vtanh.f32 %v667_v61  ;;  %v668_v40 = vadd.f32 %v4858_v17, %v368_v59  ;;  %v675_v44 = vadd.f32 %v4860_v63, %v375_v24  ;;  %v376_v60 = vmul.f32 %v3267_v55, %v4859_v16  ;;  %v4861_v59 = vld [vmem:[#allocation57_spill] sm:$0xff] }
 0x16d   :  { %2197 = vmatpush1.bf16.msra.mxu1 %v2196_v28  ;;  %v2526_v41 = vpop.eup %2525  ;;  %2153 = vmatpush1.bf16.msra.mxu0 %v2152_v6  ;;  %2545 = vtanh.f32 %v661_v51  ;;  %v2200_v62 = vpack.c.bf16 %v2524_v54, %v2522_v5  ;;  %v374_v28 = vmul.f32 %v3263_v19, %v4859_v16  ;;  %v677_v10 = vadd.f32 %v4860_v63, %v377_v39  ;;  %v4862_v51 = vld [vmem:[#allocation36_spill] sm:$0xff] }
 0x16e   :  { %2199 = vmatprep.subr.bf16.mxu1 %v2198_v8  ;;  %v2528_v37 = vpop.eup %2527  ;;  %2547 = vtanh.f32 %v669_v33  ;;  %v399_v27 = vmul.f32 %v3238_v11, %v4862_v51  ;;  %v4863_v8 = vld [vmem:[#allocation62_spill] sm:$0xff]  ;;  %v401_v6 = vmul.f32 %v3273_v58, %v4862_v51 }
 0x16f   :  { %v2530_v52 = vpop.eup %2529  ;;  %v2154_v13 = vpack.c.bf16 %v2528_v37, %v2526_v41  ;;  %2549 = vtanh.f32 %v658_v0  ;;  %v674_v61 = vadd.f32 %v4860_v63, %v374_v28  ;;  %v676_v0 = vadd.f32 %v4860_v63, %v376_v60  ;;  %v4864_v41 = vld [vmem:[#allocation58_spill] sm:$0xff]  ;;  %v4866_v28 = vld [vmem:[#allocation59_spill] sm:$0xff] }
 0x170   :  { %v2532_v43 = vpop.eup %2531  ;;  %2551 = vtanh.f32 %v666_v46  ;;  %v398_v46 = vmul.f32 %v3263_v19, %v4862_v51 }
 0x171   :  { %2201 = vmatpush1.bf16.msra.mxu1 %v2200_v62  ;;  %v2534_v4 = vpop.eup %2533  ;;  %2155 = vmatprep.subr.bf16.mxu0 %v2154_v13  ;;  %v2202_v42 = vpack.c.bf16 %v2532_v43, %v2530_v52  ;;  %2553 = vtanh.f32 %v660_v15  ;;  %v4865_v15 = vld [vmem:[#allocation38_spill] sm:$0xff]  ;;  %v400_v52 = vmul.f32 %v3267_v55, %v4862_v51  ;;  %v4867_v43 = vld [vmem:[#allocation37_spill] sm:$0xff] }
 0x172   :  { %v2536_v18 = vpop.eup %2535  ;;  %2555 = vtanh.f32 %v668_v40  ;;  %v699_v39 = vadd.f32 %v4865_v15, %v399_v27  ;;  %v701_v13 = vadd.f32 %v4865_v15, %v401_v6  ;;  %v409_v60 = vmul.f32 %v3273_v58, %v4867_v43  ;;  %v4868_v27 = vld [vmem:[#allocation21_spill] sm:$0xff] }
 0x173   :  { %v2538_v20 = vpop.eup %2537  ;;  %2203 = vmatprep.subr.bf16.mxu1 %v2202_v42  ;;  %v2156_v17 = vpack.c.bf16 %v2536_v18, %v2534_v4  ;;  %2557 = vtanh.f32 %v675_v44  ;;  %v407_v4 = vmul.f32 %v3238_v11, %v4867_v43  ;;  %v408_v18 = vmul.f32 %v3267_v55, %v4867_v43 }
 0x174   :  { %v2540_v7 = vpop.eup %2539  ;;  %2559 = vtanh.f32 %v4861_v59 }
 0x175   :  { %v2542_v25 = vpop.eup %2541  ;;  %2157 = vmatpush1.bf16.msra.mxu0 %v2156_v17  ;;  %v2204_v33 = vpack.c.bf16 %v2540_v7, %v2538_v20  ;;  %2561 = vtanh.f32 %v677_v10  ;;  %v406_v10 = vmul.f32 %v3263_v19, %v4867_v43  ;;  %v698_v20 = vadd.f32 %v4865_v15, %v398_v46 }
 0x176   :  { %v2544_v5 = vpop.eup %2543  ;;  %2563 = vtanh.f32 %v4863_v8  ;;  %v700_v7 = vadd.f32 %v4865_v15, %v400_v52  ;;  %v4869_v8 = vld [vmem:[#allocation39_spill] sm:$0xff]  ;;  %v1640_v15 = vstv %s3817_s11  ;;  %s4160_s11 = sld [smem:[#allocation8 + $0x6]] }
 0x177   :  { %v2546_v16 = vpop.eup %2545  ;;  %2205 = vmatpush1.bf16.msra.mxu1 %v2204_v33  ;;  %v2158_v24 = vpack.c.bf16 %v2544_v5, %v2542_v25  ;;  %2565 = vtanh.f32 %v674_v61  ;;  %v707_v25 = vadd.f32 %v4868_v27, %v407_v4  ;;  %v709_v33 = vadd.f32 %v4868_v27, %v409_v60 }
 0x178   :  { %v2548_v54 = vpop.eup %2547  ;;  %2567 = vtanh.f32 %v4864_v41  ;;  %v708_v5 = vadd.f32 %v4868_v27, %v408_v18  ;;  %v431_v6 = vmul.f32 %v3238_v11, %v4869_v8  ;;  %v4870_v41 = vld [vmem:[#allocation15_spill] sm:$0xff] }
 0x179   :  { %v2550_v37 = vpop.eup %2549  ;;  %2159 = vmatprep.subr.bf16.mxu0 %v2158_v24  ;;  %v2206_v62 = vpack.c.bf16 %v2548_v54, %v2546_v16  ;;  %2569 = vtanh.f32 %v676_v0  ;;  %v1480_v54 = vstv %s3811_s8  ;;  %vm992_vm1 = vcmp.eq.s32.totalorder %v4870_v41, 0  ;;  %s4149_s8 = sld [smem:[#allocation5 + $0x7]] }
 0x17a   :  { %v2552_v40 = vpop.eup %2551  ;;  %2571 = vtanh.f32 %v4866_v28 }
 0x17b   :  { %v2554_v63 = vpop.eup %2553  ;;  %2207 = vmatprep.subr.bf16.mxu1 %v2206_v62  ;;  %v2160_v44 = vpack.c.bf16 %v2552_v40, %v2550_v37  ;;  %2573 = vtanh.f32 %v3477_v35  ;;  %v4871_v40 = vld [vmem:[#allocation17_spill] sm:$0xff] }
 0x17c   :  { %v2556_v42 = vpop.eup %2555  ;;  %2575 = vtanh.f32 %v699_v39  ;;  %v1641_v39 = vstv %s3819_s12  ;;  %v3851_v52 = vadd.f32 -0.25, %v4871_v40  ;;  %v3854_v28 = vadd.f32 -0.5, %v4871_v40  ;;  %s4162_s12 = sld [smem:[#allocation8 + $0x7]] }
 0x17d   :  { %v2558_v35 = vpop.eup %2557  ;;  %2161 = vmatpush1.bf16.msra.mxu0 %v2160_v44  ;;  %v2208_v17 = vpack.c.bf16 %v2556_v42, %v2554_v63  ;;  %2577 = vtanh.f32 %v3486_v48  ;;  %v706_v48 = vadd.f32 %v4868_v27, %v406_v10  ;;  %v1801_v63 = vstv %s3831_s13  ;;  %v4872_v42 = vld [vmem:[#allocation42_spill] sm:$0xff]  ;;  %s4178_s13 = sld [smem:[#allocation10 + $0x6]] }
 0x17e   :  { %v2560_v61 = vpop.eup %2559  ;;  %2579 = vtanh.f32 %v701_v13  ;;  %v1802_v44 = vstv %s3833_s14  ;;  %v3865_v60 = vsel %vm992_vm1, %v1640_v15, %v1641_v39  ;;  %v1520_v10 = vrot.slane %v3851_v52, %v4872_v42  ;;  %v4878_v39 = vld [vmem:[#allocation65_spill] sm:$0xff]  ;;  %s4180_s14 = sld [smem:[#allocation10 + $0x7]] }
 0x17f   :  { %v2562_v59 = vpop.eup %2561  ;;  %2209 = vmatpush1.bf16.msra.mxu1 %v2208_v17  ;;  %v2162_v51 = vpack.c.bf16 %v2560_v61, %v2558_v35  ;;  %2581 = vtanh.f32 %v3491_v14  ;;  %v1479_v14 = vstv %s3809_s10  ;;  %v1681_v35 = vrot.slane %v3854_v28, %v4872_v42  ;;  %s4147_s10 = sld [smem:[#allocation5 + $0x6]] }
 0x180   :  { %v2564_v0 = vpop.eup %2563  ;;  %2583 = vtanh.f32 %v698_v20  ;;  %v3859_v13 = vsel %vm992_vm1, %v1479_v14, %v1480_v54  ;;  %v3873_v20 = vadd.f32 -0.75, %v4871_v40  ;;  %v4876_v14 = vld [vmem:[#allocation64_spill] sm:$0xff]  ;;  %vm1573_vm2 = vcmp.ge.f32.partialorder %v4871_v40, 0.25 }
 0x181   :  { %v2566_v16 = vpop.eup %2565  ;;  %2163 = vmatprep.subr.bf16.mxu0 %v2162_v51  ;;  %v2210_v24 = vpack.c.bf16 %v2564_v0, %v2562_v59  ;;  %2585 = vtanh.f32 %v3505_v21  ;;  %v3882_v59 = vmul.f32 %v1520_v10, %v3859_v13  ;;  %v4874_v51 = vld [vmem:[#allocation52_spill] sm:$0xff]  ;;  %vm1574_vm3 = vcmp.lt.f32.partialorder %v4871_v40, 0.5 }
 0x182   :  { %v2568_v46 = vpop.eup %2567  ;;  %2587 = vtanh.f32 %v700_v7  ;;  %v3879_v7 = vsel %vm992_vm1, %v1801_v63, %v1802_v44  ;;  %v731_v27 = vadd.f32 %v4874_v51, %v431_v6  ;;  %v4880_v63 = vld [vmem:[#allocation43_spill] sm:$0xff]  ;;  %vm1734_vm4 = vcmp.ge.f32.partialorder %v4871_v40, 0.5  ;;  %vm1575_vm9 = vmand %vm1573_vm2, %vm1574_vm3 }
 0x183   :  { %v2570_v37 = vpop.eup %2569  ;;  %2211 = vmatprep.subr.bf16.mxu1 %v2210_v24  ;;  %v2164_v62 = vpack.c.bf16 %v2568_v46, %v2566_v16  ;;  %2589 = vtanh.f32 %v707_v25  ;;  %4873 = vst [vmem:[#allocation26_spill] sm:$0xff] %v3882_v59  ;;  %v3887_v25 = vmul.f32 %v1681_v35, %v3865_v60  ;;  %v430_v24 = vmul.f32 %v3263_v19, %v4869_v8 }
 0x184   :  { %v2572_v21 = vpop.eup %2571  ;;  %2591 = vtanh.f32 %v3541_v50  ;;  %v433_v50 = vmul.f32 %v3273_v58, %v4869_v8  ;;  %v432_v46 = vmul.f32 %v3267_v55, %v4869_v8  ;;  %v1528_v44 = vrot.slane %v3851_v52, %v4880_v63 }
 0x185   :  { %v2574_v43 = vpop.eup %2573  ;;  %2165 = vmatpush1.bf16.msra.mxu0 %v2164_v62  ;;  %v2212_v4 = vpack.c.bf16 %v2572_v21, %v2570_v37  ;;  %2593 = vtanh.f32 %v709_v33  ;;  %4875 = vst [vmem:[#allocation27_spill] sm:$0xff] %v3887_v25  ;;  %v1842_v33 = vrot.slane %v3873_v20, %v4872_v42  ;;  %v730_v21 = vadd.f32 %v4874_v51, %v430_v24 }
 0x186   :  { %v2576_v18 = vpop.eup %2575  ;;  %2595 = vtanh.f32 %v3562_v23  ;;  %v1850_v24 = vrot.slane %v3873_v20, %v4880_v63  ;;  %vm1735_vm5 = vcmp.lt.f32.partialorder %v4871_v40, 0.75  ;;  %vm1414_vm6 = vcmp.lt.f32.partialorder %v4871_v40, 0.25 }
 0x187   :  { %v2578_v17 = vpop.eup %2577  ;;  %2213 = vmatpush1.bf16.msra.mxu1 %v2212_v4  ;;  %v2166_v61 = vpack.c.bf16 %v2576_v18, %v2574_v43  ;;  %2597 = vtanh.f32 %v706_v48  ;;  %v3896_v6 = vmul.f32 %v1842_v33, %v3879_v7  ;;  %v1689_v43 = vrot.slane %v3854_v28, %v4880_v63  ;;  %v4881_v18 = vld [vmem:[#allocation67_spill] sm:$0xff]  ;;  %vm4022_vm10 = vmand %vm1734_vm4, %vm1735_vm5 }
 0x188   :  { %v2580_v23 = vpop.eup %2579  ;;  %2599 = vtanh.f32 %v3556_v22  ;;  %v733_v22 = vadd.f32 %v4874_v51, %v433_v50  ;;  %vm1895_vm7 = vcmp.ge.f32.partialorder %v4871_v40, 0.75  ;;  %vm1896_vm8 = vcmp.le.f32.partialorder %v4871_v40, 1.0 }
 0x189   :  { %v2582_v0 = vpop.eup %2581  ;;  %2167 = vmatprep.subr.bf16.mxu0 %v2166_v61  ;;  %v2214_v48 = vpack.c.bf16 %v2580_v23, %v2578_v17  ;;  %2601 = vtanh.f32 %v708_v5  ;;  %4877 = vst [vmem:[#allocation53_spill] sm:$0xff] %v3896_v6  ;;  %v4879_v5 = vld [vmem:[#allocation46_spill] sm:$0xff]  ;;  %v732_v17 = vadd.f32 %v4874_v51, %v432_v46  ;;  %v3915_v61 = vmul.f32 %v1528_v44, %v3859_v13  ;;  %vm1897_vm11 = vmand %vm1895_vm7, %vm1896_vm8 }
 0x18a   :  { %v2584_v16 = vpop.eup %2583  ;;  %2603 = vtanh.f32 %v4876_v14  ;;  %v439_v37 = vmul.f32 %v3238_v11, %v4879_v5  ;;  %v438_v8 = vmul.f32 %v3263_v19, %v4879_v5  ;;  %v441_v50 = vmul.f32 %v3273_v58, %v4879_v5 }
 0x18b   :  { %v2586_v54 = vpop.eup %2585  ;;  %2215 = vmatprep.subr.bf16.mxu1 %v2214_v48  ;;  %v2168_v15 = vpack.c.bf16 %v2584_v16, %v2582_v0  ;;  %2605 = vtanh.f32 %v4878_v39  ;;  %4882 = vst [vmem:[#allocation41_spill] sm:$0xff] %v3915_v61  ;;  %v3918_v23 = vmul.f32 %v1689_v43, %v3865_v60  ;;  %v4884_v0 = vld [vmem:[#allocation66_spill] sm:$0xff]  ;;  %v4885_v48 = vld [vmem:[#allocation24_spill] sm:$0xff]  ;;  %v440_v51 = vmul.f32 %v3267_v55, %v4879_v5 }
 0x18c   :  { %v2588_v62 = vpop.eup %2587  ;;  %2607 = vtanh.f32 %v731_v27  ;;  %v739_v16 = vadd.f32 %v4885_v48, %v439_v37  ;;  %v741_v46 = vadd.f32 %v4885_v48, %v441_v50  ;;  %v4887_v37 = vld [vmem:[#allocation40_spill] sm:$0xff]  ;;  %v738_v5 = vadd.f32 %v4885_v48, %v438_v8 }
 0x18d   :  { %v2590_v4 = vpop.eup %2589  ;;  %2169 = vmatpush1.bf16.msra.mxu0 %v2168_v15  ;;  %v2216_v10 = vpack.c.bf16 %v2588_v62, %v2586_v54  ;;  %2609 = vtanh.f32 %v4881_v18  ;;  %4883 = vst [vmem:[#allocation61_spill] sm:$0xff] %v3918_v23  ;;  %v3929_v15 = vmul.f32 %v1850_v24, %v3879_v7  ;;  %v1524_v62 = vrot.slane %v3851_v52, %v4887_v37  ;;  %v4892_v24 = vld [vmem:[#allocation63_spill] sm:$0xff] }
 0x18e   :  { %v2592_v35 = vpop.eup %2591  ;;  %2611 = vtanh.f32 %v733_v22  ;;  %v1846_v8 = vrot.slane %v3873_v20, %v4887_v37  ;;  %v1807_v23 = vstv %s4162_s12  ;;  %v1811_v61 = vstv %s4178_s13 }
 0x18f   :  { %v2594_v27 = vpop.eup %2593  ;;  %2217 = vmatpush1.bf16.msra.mxu1 %v2216_v10  ;;  %v2170_v33 = vpack.c.bf16 %v2592_v35, %v2590_v4  ;;  %2613 = vtanh.f32 %v4884_v0  ;;  %4886 = vst [vmem:[#allocation60_spill] sm:$0xff] %v3929_v15  ;;  %v740_v4 = vadd.f32 %v4885_v48, %v440_v51  ;;  %v3939_v10 = vmul.f32 %v1524_v62, %v3859_v13 }
 0x190   :  { %v2596_v14 = vpop.eup %2595  ;;  %2615 = vtanh.f32 %v730_v21  ;;  %v1685_v21 = vrot.slane %v3854_v28, %v4887_v37  ;;  %v3950_v48 = vmul.f32 %v1846_v8, %v3879_v7  ;;  %v1812_v6 = vstv %s4180_s14 }
 0x191   :  { %v2598_v22 = vpop.eup %2597  ;;  %2171 = vmatprep.subr.bf16.mxu0 %v2170_v33  ;;  %v2218_v54 = vpack.c.bf16 %v2596_v14, %v2594_v27  ;;  %2617 = vtanh.f32 %v3628_v1  ;;  %4888 = vst [vmem:[#allocation29_spill] sm:$0xff] %v3939_v10  ;;  %v4890_v27 = vld [vmem:[#allocation51_spill] sm:$0xff]  ;;  %v1650_v10 = vstv %s4133_s1 }
 0x192   :  { %v2600_v39 = vpop.eup %2599  ;;  %2619 = vtanh.f32 %v732_v17  ;;  %v3942_v35 = vmul.f32 %v1685_v21, %v3865_v60  ;;  %4891 = vst [vmem:[#allocation54_spill] sm:$0xff] %v3950_v48  ;;  %v465_v51 = vmul.f32 %v3273_v58, %v4890_v27 }
 0x193   :  { %v2602_v44 = vpop.eup %2601  ;;  %2219 = vmatprep.subr.bf16.mxu1 %v2218_v54  ;;  %v2172_v43 = vpack.c.bf16 %v2600_v39, %v2598_v22  ;;  %2621 = vtanh.f32 %v739_v16  ;;  %v4893_v22 = vld [vmem:[#allocation47_spill] sm:$0xff] }
 0x194   :  { %v2604_v1 = vpop.eup %2603  ;;  %2623 = vtanh.f32 %v3644_v2  ;;  %4889 = vst [vmem:[#allocation44_spill] sm:$0xff] %v3942_v35  ;;  %v463_v2 = vmul.f32 %v3238_v11, %v4890_v27  ;;  %v1693_v39 = vrot.slane %v3854_v28, %v4893_v22  ;;  %v1646_v35 = vstv %s4121_s30 }
 0x195   :  { %v2606_v18 = vpop.eup %2605  ;;  %2173 = vmatpush1.bf16.msra.mxu0 %v2172_v43  ;;  %v2220_v50 = vpack.c.bf16 %v2604_v1, %v2602_v44  ;;  %2625 = vtanh.f32 %v741_v46  ;;  %v462_v44 = vmul.f32 %v3263_v19, %v4890_v27  ;;  %v4895_v1 = vld [vmem:[#allocation55_spill] sm:$0xff] }
 0x196   :  { %v2608_v17 = vpop.eup %2607  ;;  %2627 = vtanh.f32 %v3647_v36  ;;  %v763_v14 = vadd.f32 %v4892_v24, %v463_v2  ;;  %v1532_v36 = vrot.slane %v3851_v52, %v4893_v22 }
 0x197   :  { %v2610_v33 = vpop.eup %2609  ;;  %2221 = vmatpush1.bf16.msra.mxu1 %v2220_v50  ;;  %v2174_v0 = vpack.c.bf16 %v2608_v17, %v2606_v18  ;;  %2629 = vtanh.f32 %v738_v5  ;;  %v3971_v18 = vmul.f32 %v1693_v39, %v3865_v60  ;;  %v762_v8 = vadd.f32 %v4892_v24, %v462_v44 }
 0x198   :  { %v2612_v16 = vpop.eup %2611  ;;  %2631 = vtanh.f32 %v3650_v53  ;;  %v765_v53 = vadd.f32 %v4892_v24, %v465_v51  ;;  %v3965_v43 = vmul.f32 %v1532_v36, %v3859_v13  ;;  %v1854_v17 = vrot.slane %v3873_v20, %v4893_v22 }
 0x199   :  { %v2614_v54 = vpop.eup %2613  ;;  %2175 = vmatprep.subr.bf16.mxu0 %v2174_v0  ;;  %v2222_v46 = vpack.c.bf16 %v2612_v16, %v2610_v33  ;;  %2633 = vtanh.f32 %v740_v4  ;;  %v471_v4 = vmul.f32 %v3238_v11, %v4895_v1  ;;  %4896 = vst [vmem:[#allocation14_spill] sm:$0xff] %v3971_v18  ;;  %v470_v51 = vmul.f32 %v3263_v19, %v4895_v1 }
 0x19a   :  { %v2616_v62 = vpop.eup %2615  ;;  %2635 = vtanh.f32 %v3655_v3  ;;  %4894 = vst [vmem:[#allocation28_spill] sm:$0xff] %v3965_v43  ;;  %v464_v3 = vmul.f32 %v3267_v55, %v4890_v27  ;;  %v3983_v27 = vmul.f32 %v1854_v17, %v3879_v7  ;;  %v1645_v18 = vstv %s4119_s29 }
 0x19b   :  { %v2618_v5 = vpop.eup %2617  ;;  %2223 = vmatprep.subr.bf16.mxu1 %v2222_v46  ;;  %v2176_v21 = vpack.c.bf16 %v2616_v62, %v2614_v54  ;;  %2637 = vtanh.f32 %v3669_v49  ;;  %v473_v49 = vmul.f32 %v3273_v58, %v4895_v1  ;;  %v4898_v54 = vld [vmem:[#allocation56_spill] sm:$0xff]  ;;  %v472_v62 = vmul.f32 %v3267_v55, %v4895_v1 }
 0x19c   :  { %v2620_v50 = vpop.eup %2619  ;;  %2639 = vtanh.f32 %v763_v14  ;;  %v764_v16 = vadd.f32 %v4892_v24, %v464_v3  ;;  %4897 = vst [vmem:[#allocation30_spill] sm:$0xff] %v3983_v27  ;;  %v1636_v27 = vstv %s4107_s28  ;;  %v1796_v43 = vstv %s4147_s10 }
 0x19d   :  { %v2622_v2 = vpop.eup %2621  ;;  %2177 = vmatpush1.bf16.msra.mxu0 %v2176_v21  ;;  %v2224_v33 = vpack.c.bf16 %v2620_v50, %v2618_v5  ;;  %2641 = vtanh.f32 %v3678_v9  ;;  %v771_v9 = vadd.f32 %v4898_v54, %v471_v4  ;;  %v773_v44 = vadd.f32 %v4898_v54, %v473_v49 }
 0x19e   :  { %v2624_v0 = vpop.eup %2623  ;;  %2643 = vtanh.f32 %v765_v53  ;;  %v772_v3 = vadd.f32 %v4898_v54, %v472_v62 }
 0x19f   :  { %v2626_v14 = vpop.eup %2625  ;;  %2225 = vmatpush1.bf16.msra.mxu1 %v2224_v33  ;;  %v2178_v36 = vpack.c.bf16 %v2624_v0, %v2622_v2  ;;  %2645 = vtanh.f32 %v3672_v31  ;;  %v770_v31 = vadd.f32 %v4898_v54, %v470_v51 }
 0x1a0   :  { %v2628_v46 = vpop.eup %2627  ;;  %2647 = vtanh.f32 %v762_v8 }
 0x1a1   :  { %v2630_v39 = vpop.eup %2629  ;;  %2179 = vmatprep.subr.bf16.mxu0 %v2178_v36  ;;  %v2226_v24 = vpack.c.bf16 %v2628_v46, %v2626_v14  ;;  %2649 = vtanh.f32 %v3685_v30 }
 0x1a2   :  { %v2632_v53 = vpop.eup %2631  ;;  %2651 = vtanh.f32 %v764_v16 }
 0x1a3   :  { %v2634_v5 = vpop.eup %2633  ;;  %2227 = vmatprep.subr.bf16.mxu1 %v2226_v24  ;;  %v2180_v21 = vpack.c.bf16 %v2632_v53, %v2630_v39  ;;  %2653 = vtanh.f32 %v771_v9 }
 0x1a4   :  { %v2636_v4 = vpop.eup %2635  ;;  %2655 = vtanh.f32 %v3707_v12 }
 0x1a5   :  { %v2638_v50 = vpop.eup %2637  ;;  %2181 = vmatpush1.bf16.msra.mxu0 %v2180_v21  ;;  %v2228_v1 = vpack.c.bf16 %v2636_v4, %v2634_v5  ;;  %2657 = vtanh.f32 %v773_v44  ;;  %v1297_v21 = vmul.f32 %v3851_v52, %v4871_v40 }
 0x1a6   :  { %v2640_v30 = vpop.eup %2639  ;;  %2659 = vtanh.f32 %v3710_v32 }
 0x1a7   :  { %v2642_v8 = vpop.eup %2641  ;;  %2229 = vmatpush1.bf16.msra.mxu1 %v2228_v1  ;;  %v2182_v17 = vpack.c.bf16 %v2640_v30, %v2638_v50  ;;  %2661 = vtanh.f32 %v770_v31  ;;  %v1299_v31 = vmul.f32 %v3854_v28, %v1297_v21  ;;  %v2017_v50 = vadd.f32 -1.0, %v4871_v40  ;;  %v4903_v40 = vld [vmem:[#allocation20_spill] sm:$0xff] }
 0x1a8   :  { %v2644_v2 = vpop.eup %2643  ;;  %2663 = vtanh.f32 %v3698_v26  ;;  %v1361_v1 = vstv %s1359_s17  ;;  %v1362_v30 = vstv %s2019_s5 }
 0x1a9   :  { %v2646_v33 = vpop.eup %2645  ;;  %2183 = vmatprep.subr.bf16.mxu0 %v2182_v17  ;;  %v2230_v49 = vpack.c.bf16 %v2644_v2, %v2642_v8  ;;  %2665 = vtanh.f32 %v772_v3  ;;  %v1301_v4 = vmul.f32 %v3873_v20, %v1299_v31  ;;  %v995_v8 = vstv %s993_s0 }
 0x1aa   :  { %v2648_v12 = vpop.eup %2647  ;;  %2667 = vtanh.f32 %v3720_v34  ;;  %v996_v17 = vstv %s2008_s7  ;;  %v4020_v2 = vsel %vm992_vm1, %v1361_v1, %v1362_v30  ;;  %v1366_v31 = vstv %s4039_s19 }
 0x1ab   :  { %v2650_v0 = vpop.eup %2649  ;;  %2669 = vtanh.f32 %v3609_v38  ;;  %2231 = vmatprep.subr.bf16.mxu1 %v2230_v49  ;;  %v2184_v16 = vpack.c.bf16 %v2648_v12, %v2646_v33  ;;  %v1303_v3 = vmul.f32 %v2017_v50, %v1301_v4  ;;  %4899 = vst [vmem:[#allocation32_spill] sm:$0xff] %v4020_v2  ;;  %v4902_v12 = vmov 0   ;;  %v4906_v50 = vld [vmem:[#allocation18_spill] sm:$0xff] }
 0x1ac   :  { %v2652_v32 = vpop.eup %2651  ;;  %2671 = vtanh.f32 %v3613_v57  ;;  %v4113_v4 = vmul.f32 %v4020_v2, %v2983_v56  ;;  %v1508_v1 = vrot.slane %v3851_v52, %v4906_v50  ;;  %v4188_v56 = vmul.f32 %v4020_v2, %v2958_v45 }
 0x1ad   :  { %v2654_v14 = vpop.eup %2653  ;;  %2185 = vmatpush1.bf16.msra.mxu0 %v2184_v16  ;;  %v2232_v51 = vpack.c.bf16 %v2652_v32, %v2650_v0  ;;  %2673 = vtanh.f32 %v3607_v47  ;;  %v4026_v49 = vmul.f32 10.0, %v1303_v3  ;;  %v4033_v0 = vsel %vm1414_vm6, 1, %v4902_v12 }
 0x1ae   :  { %v2656_v36 = vpop.eup %2655  ;;  %2675 = vtanh.f32 %v3611_v29  ;;  %v2677_v29 = vld.sshfl [vmem:[%s4691_s3] sm:$0x33 pattern:$0x76325410]  ;;  %s4028_s3 = sld [smem:[#allocation5]]  ;;  %v1504_v16 = vrot.slane %v3851_v52, %v4903_v40  ;;  %v1665_v32 = vrot.slane %v3854_v28, %v4903_v40  ;;  %v1669_v3 = vrot.slane %v3854_v28, %v4906_v50 }
 0x1af   :  { %v2658_v26 = vpop.eup %2657  ;;  %2233 = vmatpush1.bf16.msra.mxu1 %v2232_v51  ;;  %v2186_v54 = vpack.c.bf16 %v2656_v36, %v2654_v14  ;;  %v4044_v14 = vsel %vm1575_vm9, 1, %v4902_v12  ;;  %v1826_v51 = vrot.slane %v3873_v20, %v4903_v40  ;;  %v4050_v36 = vsel %vm992_vm1, %v995_v8, %v996_v17 }
 0x1b0   :  { %v2660_v9 = vpop.eup %2659 }
 0x1b1   :  { %v2662_v34 = vpop.eup %2661  ;;  %2187 = vmatprep.subr.bf16.mxu0 %v2186_v54  ;;  %v2234_v38 = vpack.c.bf16 %v2660_v9, %v2658_v26  ;;  %v4904_v26 = vld [vmem:[#allocation23_spill] sm:$0xff]  ;;  %v4063_v9 = vsel %vm4022_vm10, 1, %v4902_v12 }
 0x1b2   :  { %v2664_v46 = vpop.eup %2663  ;;  %v4058_v54 = vmul.f32 %v4020_v2, %v4904_v26 }
 0x1b3   :  { %v2666_v39 = vpop.eup %2665  ;;  %2235 = vmatprep.subr.bf16.mxu1 %v2234_v38  ;;  %v2188_v62 = vpack.c.bf16 %v2664_v46, %v2662_v34  ;;  %v4072_v38 = vsel %vm1897_vm11, 1, %v4902_v12  ;;  %v4905_v46 = vld [vmem:[#allocation25_spill] sm:$0xff]  ;;  %v4165_v12 = vmul.f32 %v1508_v1, %v3859_v13  ;;  %v1371_v1 = vstv %s4052_s21 }
 0x1b4   :  { %v2668_v24 = vpop.eup %2667  ;;  %v1834_v21 = vrot.slane %v3873_v20, %v4905_v46  ;;  %v1356_v30 = vstv %s4028_s3  ;;  %v1484_v34 = vstv %s4080_s25  ;;  %v4929_v19 = vrot.slane %v4072_v38, %v4903_v40 }
 0x1b5   :  { %v2670_v57 = vpop.eup %2669  ;;  %2189 = vmatpush1.bf16.msra.mxu0 %v2188_v62  ;;  %v2236_v44 = vpack.c.bf16 %v2668_v24, %v2666_v39  ;;  %v1512_v39 = vrot.slane %v3851_v52, %v4905_v46  ;;  %v1673_v62 = vrot.slane %v3854_v28, %v4905_v46  ;;  %v1490_v24 = vstv %s4094_s26 }
 0x1b6   :  { %1202 = vmatprep.subr.mxu0 %v2670_v57  ;;  %v2672_v53 = vpop.eup %2671  ;;  %v4085_v57 = vmul.f32 %v1504_v16, %v3859_v13  ;;  %v4152_v26 = vmul.f32 %v1834_v21, %v3879_v7  ;;  %v4168_v21 = vmul.f32 %v1669_v3, %v3865_v60  ;;  %v1372_v3 = vstv %s4054_s22 }
 0x1b7   :  { %2237 = vmatpush1.bf16.msra.mxu1 %v2236_v44  ;;  %v2674_v47 = vpop.eup %2673  ;;  %v4126_v8 = vmul.f32 %v1512_v39, %v3859_v13  ;;  %v4131_v17 = vmul.f32 %v1673_v62, %v3865_v60  ;;  %v4908_v62 = vld [vmem:[#allocation19_spill] sm:$0xff]  ;;  %v4213_v33 = vsel %vm992_vm1, %v1371_v1, %v1372_v3  ;;  %v1635_v16 = vstv %s4105_s27 }
 0x1b8   :  { %1273 = vmatprep.subr.mxu1 %v2672_v53  ;;  %v2676_v5 = vpop.eup %2675  ;;  %v4090_v53 = vmul.f32 %v1665_v32, %v3865_v60  ;;  %v4907_v32 = vld [vmem:[#allocation22_spill] sm:$0xff]  ;;  %v1797_v44 = vstv %s4149_s8  ;;  %v1651_v1 = vstv %s4135_s2  ;;  %v1806_v3 = vstv %s4160_s11 }
 0x1b9   :  { %1203 = vmatpush1.msra.mxu0 %v2674_v47  ;;  %v1367_v47 = vstv %s4041_s20  ;;  %v4240_v58 = vsel %vm992_vm1, %v1635_v16, %v1636_v27  ;;  %v4244_v22 = vsel %vm992_vm1, %v1796_v43, %v1797_v44  ;;  %v4260_v27 = vsel %vm992_vm1, %v1645_v18, %v1646_v35 }
 0x1ba   :  { %1219 = vmatmul.mubr.f32.vlgmr.msra.gmra.mrb[2].mxu0 %v2677_v29  ;;  %v4910_v43 = vrot.slane %v4033_v0, %v4903_v40  ;;  %v4282_v35 = vsel %vm992_vm1, %v1806_v3, %v1807_v23  ;;  %v4286_v18 = vsel %vm992_vm1, %v1811_v61, %v1812_v6  ;;  %v4916_v44 = vrot.slane %v4026_v49, %v4906_v50 }
 0x1bb   :  { %1274 = vmatpush1.msra.mxu1 %v2676_v5  ;;  %v4099_v5 = vmul.f32 %v1826_v51, %v3879_v7  ;;  %v4145_v51 = vmul.f32 %v4020_v2, %v4907_v32  ;;  %v1830_v32 = vrot.slane %v3873_v20, %v4906_v50  ;;  %v4917_v23 = vrot.slane %v4033_v0, %v4906_v50 }
 0x1bc   :  { %1290 = vmatmul.mubr.f32.vlgmr.msra.gmra.mrb[2].mxu1 %v2677_v29  ;;  %v1357_v29 = vstv %s4030_s18  ;;  %vm4265_vm12 = vcmp.eq.s32.totalorder %v4910_v43, 1  ;;  %v4920_v6 = vrot.slane %v4044_v14, %v4906_v50  ;;  %v4923_v61 = vrot.slane %v4063_v9, %v4903_v40 }
 0x1bd   :  { %v4191_v39 = vmul.f32 %v1830_v32, %v3879_v7  ;;  %v4201_v45 = vsel %vm992_vm1, %v1356_v30, %v1357_v29  ;;  %v4205_v32 = vsel %vm992_vm1, %v1366_v31, %v1367_v47  ;;  %v1474_v29 = vstv %s4067_s23 }
 0x1be   :  { %v1475_v30 = vstv %s4069_s24  ;;  %v1485_v47 = vstv %s4082_s4  ;;  %v1489_v31 = vstv %s4092_s6  ;;  %vm4298_vm14 = vcmp.eq.s32.totalorder %v4917_v23, 1 }
 0x1bf   :  { %v4236_v59 = vsel %vm992_vm1, %v1474_v29, %v1475_v30  ;;  %v4252_v55 = vsel %vm992_vm1, %v1484_v34, %v1485_v47  ;;  %v4256_v29 = vsel %vm992_vm1, %v1489_v31, %v1490_v24  ;;  %v4278_v24 = vsel %vm992_vm1, %v1650_v10, %v1651_v1 }
 0x1c0   :  { %vm4305_vm15 = vcmp.eq.s32.totalorder %v4920_v6, 1  ;;  %vm4312_vm0 = vcmp.eq.s32.totalorder %v4923_v61, 1  ;;  %v4926_v61 = vrot.slane %v4063_v9, %v4906_v50  ;;  %vm4334_vm2 = vcmp.eq.s32.totalorder %v4929_v19, 1 }
 0x1c1   :  { %v4938_v3 = vrot.slane %v4033_v0, %v4905_v46 }
 0x1c2   :  { %vm4327_vm1 = vcmp.eq.s32.totalorder %v4926_v61, 1  ;;  %v4936_v61 = vrot.slane %v3854_v28, %v4908_v62 }
 0x1c3   :  { %vm4397_vm4 = vcmp.eq.s32.totalorder %v4938_v3, 1 }
 0x22f   :  { %v1078_v48 = vpop.f32.mrb[0].mxu0 }
 0x230   :  { %v1079_v15 = vadd.f32 %v1078_v48, %v4050_v36  ;;  %v1080_v25 = vpop.f32.mrb[1].mxu0  ;;  %v4909_v48 = vrot.slane %v4026_v49, %v4903_v40 }
 0x231   :  { %v1081_v11 = vadd.f32 %v1080_v25, %v4050_v36 }
 0x232   :  { %v1346_v37 = vmul.f32 %v4909_v48, %v1079_v15  ;;  %v4913_v15 = vrot.slane %v4044_v14, %v4903_v40 }
 0x233   :  { %v1347_v16 = vmul.f32 %v4916_v44, %v1081_v11 }
 0x234   :  { %vm4272_vm13 = vcmp.eq.s32.totalorder %v4913_v15, 1  ;;  %v1374_v30 = vadd.f32 %v4201_v45, %v1346_v37  ;;  %v1492_v47 = vadd.f32 %v4236_v59, %v1346_v37  ;;  %v1653_v31 = vadd.f32 %v4240_v58, %v1346_v37 }
 0x235   :  { %v1814_v10 = vadd.f32 %v4244_v22, %v1346_v37  ;;  %v1375_v37 = vadd.f32 %v4201_v45, %v1347_v16  ;;  %v1493_v48 = vadd.f32 %v4236_v59, %v1347_v16  ;;  %v1654_v43 = vadd.f32 %v4240_v58, %v1347_v16 }
 0x236   :  { %v1815_v15 = vadd.f32 %v4244_v22, %v1347_v16  ;;  %v1390_v44 = vadd.f32 %v4058_v54, %v1374_v30  ;;  %v1549_v23 = vadd.f32 %v4085_v57, %v1492_v47  ;;  %v1710_v6 = vadd.f32 %v4090_v53, %v1653_v31 }
 0x237   :  { %v1871_v63 = vadd.f32 %v4099_v5, %v1814_v10  ;;  %v1391_v54 = vadd.f32 %v4145_v51, %v1375_v37  ;;  %v1550_v57 = vadd.f32 %v4165_v12, %v1493_v48  ;;  %v1711_v53 = vadd.f32 %v4168_v21, %v1654_v43 }
 0x238   :  { %v1872_v5 = vadd.f32 %v4191_v39, %v1815_v15  ;;  %v4932_v30 = vrot.slane %v4072_v38, %v4906_v50  ;;  %v1398_v19 = vmax.f32 %v4205_v32, %v1390_v44  ;;  %v1557_v40 = vmax.f32 %v4252_v55, %v1549_v23 }
 0x239   :  { %v1718_v31 = vmax.f32 %v4260_v27, %v1710_v6  ;;  %v1879_v51 = vmax.f32 %v4282_v35, %v1871_v63  ;;  %v1399_v12 = vmax.f32 %v4205_v32, %v1391_v54  ;;  %v1558_v21 = vmax.f32 %v4252_v55, %v1550_v57 }
 0x23a   :  { %vm4345_vm3 = vcmp.eq.s32.totalorder %v4932_v30, 1  ;;  %v1719_v39 = vmax.f32 %v4260_v27, %v1711_v53  ;;  %v1880_v50 = vmax.f32 %v4282_v35, %v1872_v5  ;;  %v1406_v10 = vmin.f32 %v4213_v33, %v1398_v19  ;;  %v1149_v63 = vpop.f32.mrb[0].mxu1 }
 0x23b   :  { %v1565_v37 = vmin.f32 %v4256_v29, %v1557_v40  ;;  %v1726_v48 = vmin.f32 %v4278_v24, %v1718_v31  ;;  %v4935_v43 = vrot.slane %v3851_v52, %v4908_v62  ;;  %v1407_v44 = vmin.f32 %v4213_v33, %v1399_v12  ;;  %v1151_v5 = vpop.f32.mrb[1].mxu1 }
 0x23c   :  { %v1566_v23 = vmin.f32 %v4256_v29, %v1558_v21  ;;  %v1727_v6 = vmin.f32 %v4278_v24, %v1719_v39  ;;  %v1705_v54 = vmul.f32 %v4936_v61, %v3865_v60  ;;  %v1456_v57 = vsel %vm4265_vm12, %v1406_v10, 0.0 }
 0x23d   :  { %v1544_v15 = vmul.f32 %v4935_v43, %v3859_v13  ;;  %v1617_v53 = vsel %vm4272_vm13, %v1565_v37, 0.0  ;;  %v1887_v52 = vmin.f32 %v4286_v18, %v1879_v51  ;;  %v1888_v13 = vmin.f32 %v4286_v18, %v1880_v50 }
 0x23e   :  { %v1625_v30 = vadd.f32 %v1617_v53, %v1456_v57  ;;  %v1150_v19 = vadd.f32 %v1149_v63, %v4050_v36  ;;  %v1457_v40 = vsel %vm4298_vm14, %v1407_v44, 0.0  ;;  %v1618_v28 = vsel %vm4305_vm15, %v1566_v23, 0.0 }
 0x23f   :  { %v1778_v60 = vsel %vm4312_vm0, %v1726_v48, 0.0  ;;  %v1626_v25 = vadd.f32 %v1618_v28, %v1457_v40  ;;  %v1152_v34 = vadd.f32 %v1151_v5, %v4050_v36  ;;  %v1838_v31 = vrot.slane %v3873_v20, %v4908_v62 }
 0x240   :  { %v1786_v51 = vadd.f32 %v1778_v60, %v1625_v30  ;;  %v4937_v12 = vrot.slane %v4026_v49, %v4905_v46  ;;  %v1779_v1 = vsel %vm4327_vm1, %v1727_v6, 0.0  ;;  %v1939_v11 = vsel %vm4334_vm2, %v1887_v52, 0.0 }
 0x241   :  { %v4941_v20 = vrot.slane %v4044_v14, %v4905_v46  ;;  %v1787_v10 = vadd.f32 %v1779_v1, %v1626_v25  ;;  %v1940_v2 = vsel %vm4345_vm3, %v1888_v13, 0.0  ;;  %v4944_v16 = vrot.slane %v4026_v49, %v4908_v62 }
 0x242   :  { %v1348_v21 = vmul.f32 %v4937_v12, %v1150_v19  ;;  %v1947_v48 = vadd.f32 %v1939_v11, %v1786_v51  ;;  %v4945_v23 = vrot.slane %v4033_v0, %v4908_v62  ;;  %v2751_v11 = vmov 1983009808  }
 0x243   :  { %vm4404_vm5 = vcmp.eq.s32.totalorder %v4941_v20, 1  ;;  %v1349_v37 = vmul.f32 %v4944_v16, %v1152_v34  ;;  %v1948_v61 = vadd.f32 %v1940_v2, %v1787_v10  ;;  %v1966_v3 = vunpack.c.l.s4 %v2751_v11 }
 0x244   :  { %v1376_v43 = vadd.f32 %v4201_v45, %v1348_v21  ;;  %v1494_v63 = vadd.f32 %v4236_v59, %v1348_v21  ;;  %v1655_v44 = vadd.f32 %v4240_v58, %v1348_v21  ;;  %vm4419_vm6 = vcmp.eq.s32.totalorder %v4945_v23, 1 }
 0x245   :  { %v1816_v47 = vadd.f32 %v4244_v22, %v1348_v21  ;;  %v1377_v57 = vadd.f32 %v4201_v45, %v1349_v37  ;;  %v1495_v53 = vadd.f32 %v4236_v59, %v1349_v37  ;;  %v1656_v30 = vadd.f32 %v4240_v58, %v1349_v37 }
 0x246   :  { %v1392_v52 = vadd.f32 %v4113_v4, %v1376_v43  ;;  %v1551_v13 = vadd.f32 %v4126_v8, %v1494_v63  ;;  %v1712_v5 = vadd.f32 %v4131_v17, %v1655_v44  ;;  %v1963_v40 = vcombine.low %v1947_v48, %v1948_v61 }
 0x247   :  { %v1873_v19 = vadd.f32 %v4152_v26, %v1816_v47  ;;  %v1393_v28 = vadd.f32 %v4188_v56, %v1377_v57  ;;  %v1552_v60 = vadd.f32 %v1544_v15, %v1495_v53  ;;  %v1713_v12 = vadd.f32 %v1705_v54, %v1656_v30 }
 0x248   :  { %v1400_v25 = vmax.f32 %v4205_v32, %v1392_v52  ;;  %v1559_v34 = vmax.f32 %v4252_v55, %v1551_v13  ;;  %v1720_v51 = vmax.f32 %v4260_v27, %v1712_v5  ;;  %v4948_v26 = vrot.slane %v4044_v14, %v4908_v62 }
 0x249   :  { %v1881_v4 = vmax.f32 %v4282_v35, %v1873_v19  ;;  %v1401_v8 = vmax.f32 %v4205_v32, %v1393_v28  ;;  %v1560_v17 = vmax.f32 %v4252_v55, %v1552_v60  ;;  %v1721_v54 = vmax.f32 %v4260_v27, %v1713_v12 }
 0x24a   :  { %vm4441_vm7 = vcmp.eq.s32.totalorder %v4948_v26, 1  ;;  %v1408_v56 = vmin.f32 %v4213_v33, %v1400_v25  ;;  %v1567_v15 = vmin.f32 %v4256_v29, %v1559_v34  ;;  %v1728_v1 = vmin.f32 %v4278_v24, %v1720_v51  ;;  %v4955_v26 = vld [vmem:[#allocation32_spill] sm:$0xff] }
 0x24b   :  { %v1409_v20 = vmin.f32 %v4213_v33, %v1401_v8  ;;  %v1568_v10 = vmin.f32 %v4256_v29, %v1560_v17  ;;  %v1817_v2 = vadd.f32 %v4244_v22, %v1349_v37  ;;  %v1729_v43 = vmin.f32 %v4278_v24, %v1721_v54  ;;  %v4954_v17 = vld [vmem:[#allocation48_spill] sm:$0xff]  ;;  %v4956_v54 = vld [vmem:[#allocation43_spill] sm:$0xff] }
 0x24c   :  { %v1458_v16 = vsel %vm4397_vm4, %v1408_v56, 0.0  ;;  %v1619_v48 = vsel %vm4404_vm5, %v1567_v15, 0.0  ;;  %v1866_v63 = vmul.f32 %v1838_v31, %v3879_v7  ;;  %v4951_v23 = vrot.slane %v4063_v9, %v4905_v46 }
 0x24d   :  { %v1627_v44 = vadd.f32 %v1619_v48, %v1458_v16  ;;  %v1459_v47 = vsel %vm4419_vm6, %v1409_v20, 0.0  ;;  %v1620_v37 = vsel %vm4441_vm7, %v1568_v10, 0.0  ;;  %v1889_v61 = vmin.f32 %v4286_v18, %v1881_v4 }
 0x24e   :  { %vm1772_vm8 = vcmp.eq.s32.totalorder %v4951_v23, 1  ;;  %v1628_v50 = vadd.f32 %v1620_v37, %v1459_v47  ;;  %v1874_v57 = vadd.f32 %v1866_v63, %v1817_v2  ;;  %v1967_v52 = vunpack.c.0.s8 %v1966_v3  ;;  %v4957_v3 = vld [vmem:[#allocation49_spill] sm:$0xff]  ;;  %v4958_v63 = vld [vmem:[#allocation40_spill] sm:$0xff] }
 0x24f   :  { %v1780_v39 = vsel %vm1772_vm8, %v1728_v1, 0.0  ;;  %v4952_v7 = vrot.slane %v4063_v9, %v4908_v62  ;;  %v1914_v31 = vrot.slane %v4072_v38, %v4908_v62  ;;  %v4953_v5 = vrot.slane %v4072_v38, %v4905_v46  ;;  %v4959_v37 = vld [vmem:[#allocation45_spill] sm:$0xff] }
 0x250   :  { %v1788_v53 = vadd.f32 %v1780_v39, %v1627_v44  ;;  %v1882_v6 = vmax.f32 %v4282_v35, %v1874_v57  ;;  %v4477_v25 = vsub.s32 %v1967_v52, %v4870_v41  ;;  %v1325_v46 = vrot.slane %v4026_v49, %v4872_v42 }
 0x251   :  { %vm1773_vm9 = vcmp.eq.s32.totalorder %v4952_v7, 1  ;;  %vm1933_vm10 = vcmp.eq.s32.totalorder %v4953_v5, 1  ;;  %vm1934_vm11 = vcmp.eq.s32.totalorder %v1914_v31, 1  ;;  %v1386_v41 = vmul.f32 %v4955_v26, %v4954_v17  ;;  %v4990_v5 = vld [vmem:[#allocation29_spill] sm:$0xff] }
 0x252   :  { %v1781_v13 = vsel %vm1773_vm9, %v1729_v43, 0.0  ;;  %v1941_v19 = vsel %vm1933_vm10, %v1889_v61, 0.0  ;;  %v1890_v28 = vmin.f32 %v4286_v18, %v1882_v6  ;;  %v1971_v62 = vrot.slane %v1963_v40, %v4477_v25 }
 0x253   :  { %v1789_v30 = vadd.f32 %v1781_v13, %v1628_v50  ;;  %v1949_v60 = vadd.f32 %v1941_v19, %v1788_v53  ;;  %v1435_v21 = vrot.slane %v4033_v0, %v4872_v42  ;;  %v1596_v40 = vrot.slane %v4044_v14, %v4872_v42 }
 0x254   :  { %v1942_v34 = vsel %vm1934_vm11, %v1890_v28, 0.0  ;;  %v1757_v56 = vrot.slane %v4063_v9, %v4872_v42  ;;  %v1918_v15 = vrot.slane %v4072_v38, %v4872_v42  ;;  %v1333_v11 = vrot.slane %v4026_v49, %v4956_v54 }
 0x255   :  { %v1950_v51 = vadd.f32 %v1942_v34, %v1789_v30  ;;  %v1388_v20 = vmul.f32 %v4955_v26, %v4957_v3  ;;  %v1443_v10 = vrot.slane %v4033_v0, %v4956_v54  ;;  %v1604_v2 = vrot.slane %v4044_v14, %v4956_v54  ;;  %v4972_v3 = vld [vmem:[#allocation53_spill] sm:$0xff] }
 0x256   :  { %v1765_v48 = vrot.slane %v4063_v9, %v4956_v54  ;;  %v1926_v42 = vrot.slane %v4072_v38, %v4956_v54  ;;  %v1329_v44 = vrot.slane %v4026_v49, %v4958_v63  ;;  %v4514_v39 = vmul.f32 %v4955_v26, %v4959_v37 }
 0x257   :  { %v1964_v12 = vcombine.low %v1949_v60, %v1950_v51  ;;  %v1439_v61 = vrot.slane %v4033_v0, %v4958_v63  ;;  %v1600_v50 = vrot.slane %v4044_v14, %v4958_v63  ;;  %v1761_v52 = vrot.slane %v4063_v9, %v4958_v63  ;;  %v4968_v60 = vld [vmem:[#allocation47_spill] sm:$0xff]  ;;  %v4969_v51 = vld [vmem:[#allocation50_spill] sm:$0xff] }
 0x258   :  { %v1922_v7 = vrot.slane %v4072_v38, %v4958_v63  ;;  %vm4525_vm12 = vcmp.eq.s32.totalorder %v1435_v21, 1  ;;  %vm4529_vm13 = vcmp.eq.s32.totalorder %v1596_v40, 1  ;;  %vm4533_vm14 = vcmp.eq.s32.totalorder %v1757_v56, 1  ;;  %v4970_v56 = vld [vmem:[#allocation26_spill] sm:$0xff] }
 0x259   :  { %v1978_v4 = vrot.slane %v1964_v12, %v4477_v25  ;;  %vm4537_vm15 = vcmp.eq.s32.totalorder %v1918_v15, 1  ;;  %v1337_v34 = vrot.slane %v4026_v49, %v4968_v60  ;;  %vm4565_vm0 = vcmp.eq.s32.totalorder %v1443_v10, 1 }
 0x25a   :  { %vm4569_vm1 = vcmp.eq.s32.totalorder %v1604_v2, 1  ;;  %vm4573_vm2 = vcmp.eq.s32.totalorder %v1765_v48, 1  ;;  %vm4581_vm3 = vcmp.eq.s32.totalorder %v1926_v42, 1  ;;  %vm4600_vm4 = vcmp.eq.s32.totalorder %v1439_v61, 1 }
 0x25b   :  { %v1979_v8 = vcombine.low %v1971_v62, %v1978_v4  ;;  %v4550_v62 = vmul.f32 %v4955_v26, %v4969_v51  ;;  %v4981_v51 = vld [vmem:[#allocation41_spill] sm:$0xff]  ;;  %vm4604_vm5 = vcmp.eq.s32.totalorder %v1600_v50, 1  ;;  %vm4616_vm6 = vcmp.eq.s32.totalorder %v1761_v52, 1 }
 0x25c   :  { %v1769_v61 = vrot.slane %v4063_v9, %v4968_v60  ;;  %vm1936_vm7 = vcmp.eq.s32.totalorder %v1922_v7, 1 }
 0x25d   :  { %1999 = vst [vmem:[%s4697_s9] sm:$0xff] %v1979_v8 }
 0x25e   :  { %vm1777_vm10 = vcmp.eq.s32.totalorder %v1769_v61, 1 }
 0x28d   :  { %v1220_v1 = vpop.f32.mrb[2].mxu0 }
 0x28e   :  { %v1221_v16 = vadd.f32 %v1220_v1, %v4050_v36  ;;  %v1222_v43 = vpop.f32.mrb[3].mxu0  ;;  %v4971_v1 = vld [vmem:[#allocation27_spill] sm:$0xff] }
 0x28f   :  { %v1291_v23 = vpop.f32.mrb[2].mxu1  ;;  %v1223_v47 = vadd.f32 %v1222_v43, %v4050_v36 }
 0x290   :  { %v1350_v57 = vmul.f32 %v1325_v46, %v1221_v16  ;;  %v1292_v53 = vadd.f32 %v1291_v23, %v4050_v36  ;;  %v1293_v31 = vpop.f32.mrb[3].mxu1 }
 0x291   :  { %v4541_v19 = vmul.f32 %v1329_v44, %v1223_v47  ;;  %v4544_v28 = vadd.f32 %v1293_v31, %v4050_v36 }
 0x292   :  { %v1378_v12 = vadd.f32 %v4201_v45, %v1350_v57  ;;  %v1496_v4 = vadd.f32 %v4236_v59, %v1350_v57  ;;  %v1657_v8 = vadd.f32 %v4240_v58, %v1350_v57  ;;  %v1818_v46 = vadd.f32 %v4244_v22, %v1350_v57 }
 0x293   :  { %v1352_v17 = vmul.f32 %v1333_v11, %v1292_v53  ;;  %v1379_v36 = vadd.f32 %v4201_v45, %v4541_v19  ;;  %v1497_v21 = vadd.f32 %v4236_v59, %v4541_v19  ;;  %v1658_v40 = vadd.f32 %v4240_v58, %v4541_v19 }
 0x294   :  { %v1394_v26 = vadd.f32 %v1386_v41, %v1378_v12  ;;  %v1553_v15 = vadd.f32 %v4970_v56, %v1496_v4  ;;  %v1714_v54 = vadd.f32 %v4971_v1, %v1657_v8  ;;  %v1875_v16 = vadd.f32 %v4972_v3, %v1818_v46  ;;  %v4982_v4 = vld [vmem:[#allocation61_spill] sm:$0xff]  ;;  %v4983_v46 = vld [vmem:[#allocation60_spill] sm:$0xff] }
 0x295   :  { %v1380_v41 = vadd.f32 %v4201_v45, %v1352_v17  ;;  %v1498_v23 = vadd.f32 %v4236_v59, %v1352_v17  ;;  %v1659_v47 = vadd.f32 %v4240_v58, %v1352_v17  ;;  %v1820_v37 = vadd.f32 %v4244_v22, %v1352_v17 }
 0x296   :  { %v1402_v2 = vmax.f32 %v4205_v32, %v1394_v26  ;;  %v1561_v57 = vmax.f32 %v4252_v55, %v1553_v15  ;;  %v1722_v48 = vmax.f32 %v4260_v27, %v1714_v54  ;;  %v1883_v53 = vmax.f32 %v4282_v35, %v1875_v16  ;;  %v4994_v16 = vld [vmem:[#allocation14_spill] sm:$0xff] }
 0x297   :  { %v1396_v31 = vadd.f32 %v1388_v20, %v1380_v41  ;;  %v1555_v12 = vadd.f32 %v4981_v51, %v1498_v23  ;;  %v1716_v8 = vadd.f32 %v4982_v4, %v1659_v47  ;;  %v1877_v56 = vadd.f32 %v4983_v46, %v1820_v37  ;;  %v4991_v51 = vld [vmem:[#allocation44_spill] sm:$0xff] }
 0x298   :  { %v1410_v42 = vmin.f32 %v4213_v33, %v1402_v2  ;;  %v1569_v17 = vmin.f32 %v4256_v29, %v1561_v57  ;;  %v1730_v1 = vmin.f32 %v4278_v24, %v1722_v48  ;;  %v1891_v26 = vmin.f32 %v4286_v18, %v1883_v53 }
 0x299   :  { %v1404_v15 = vmax.f32 %v4205_v32, %v1396_v31  ;;  %v1563_v54 = vmax.f32 %v4252_v55, %v1555_v12  ;;  %v1724_v20 = vmax.f32 %v4260_v27, %v1716_v8  ;;  %v1885_v3 = vmax.f32 %v4282_v35, %v1877_v56 }
 0x29a   :  { %v1460_v23 = vsel %vm4525_vm12, %v1410_v42, 0.0  ;;  %v1621_v47 = vsel %vm4529_vm13, %v1569_v17, 0.0  ;;  %v1782_v37 = vsel %vm4533_vm14, %v1730_v1, 0.0  ;;  %v1943_v2 = vsel %vm4537_vm15, %v1891_v26, 0.0  ;;  %v4992_v26 = vld [vmem:[#allocation54_spill] sm:$0xff] }
 0x29b   :  { %v1629_v50 = vadd.f32 %v1621_v47, %v1460_v23  ;;  %v1412_v57 = vmin.f32 %v4213_v33, %v1404_v15  ;;  %v1571_v48 = vmin.f32 %v4256_v29, %v1563_v54  ;;  %v1732_v13 = vmin.f32 %v4278_v24, %v1724_v20 }
 0x29c   :  { %v1893_v6 = vmin.f32 %v4286_v18, %v1885_v3  ;;  %v1395_v53 = vadd.f32 %v4514_v39, %v1379_v36  ;;  %v1554_v31 = vadd.f32 %v4990_v5, %v1497_v21  ;;  %v1715_v30 = vadd.f32 %v4991_v51, %v1658_v40 }
 0x29d   :  { %v1790_v12 = vadd.f32 %v1782_v37, %v1629_v50  ;;  %v1462_v52 = vsel %vm4565_vm0, %v1412_v57, 0.0  ;;  %v1623_v4 = vsel %vm4569_vm1, %v1571_v48, 0.0  ;;  %v1784_v8 = vsel %vm4573_vm2, %v1732_v13, 0.0  ;;  %v4995_v48 = vld [vmem:[#allocation30_spill] sm:$0xff] }
 0x29e   :  { %v1631_v46 = vadd.f32 %v1623_v4, %v1462_v52  ;;  %v1945_v56 = vsel %vm4581_vm3, %v1893_v6, 0.0  ;;  %v1403_v39 = vmax.f32 %v4205_v32, %v1395_v53  ;;  %v1562_v36 = vmax.f32 %v4252_v55, %v1554_v31 }
 0x29f   :  { %v1951_v21 = vadd.f32 %v1943_v2, %v1790_v12  ;;  %v1723_v40 = vmax.f32 %v4260_v27, %v1715_v30  ;;  %v1819_v43 = vadd.f32 %v4244_v22, %v4541_v19  ;;  %v1353_v11 = vmul.f32 %v1337_v34, %v4544_v28 }
 0x2a0   :  { %v1792_v44 = vadd.f32 %v1784_v8, %v1631_v46  ;;  %v1411_v42 = vmin.f32 %v4213_v33, %v1403_v39  ;;  %v1570_v10 = vmin.f32 %v4256_v29, %v1562_v36  ;;  %v1447_v17 = vrot.slane %v4033_v0, %v4968_v60 }
 0x2a1   :  { %v1731_v1 = vmin.f32 %v4278_v24, %v1723_v40  ;;  %v1876_v15 = vadd.f32 %v4992_v26, %v1819_v43  ;;  %v1381_v54 = vadd.f32 %v4201_v45, %v1353_v11  ;;  %v1499_v19 = vadd.f32 %v4236_v59, %v1353_v11  ;;  %v4993_v45 = vld [vmem:[#allocation28_spill] sm:$0xff] }
 0x2a2   :  { %v1953_v20 = vadd.f32 %v1945_v56, %v1792_v44  ;;  %v1461_v49 = vsel %vm4600_vm4, %v1411_v42, 0.0  ;;  %v1622_v28 = vsel %vm4604_vm5, %v1570_v10, 0.0  ;;  %v1660_v34 = vadd.f32 %v4240_v58, %v1353_v11 }
 0x2a3   :  { %v1630_v3 = vadd.f32 %v1622_v28, %v1461_v49  ;;  %v1783_v0 = vsel %vm4616_vm6, %v1731_v1, 0.0  ;;  %v1884_v23 = vmax.f32 %v4282_v35, %v1876_v15  ;;  %v1397_v47 = vadd.f32 %v4550_v62, %v1381_v54 }
 0x2a4   :  { %v1556_v37 = vadd.f32 %v4993_v45, %v1499_v19  ;;  %v1608_v59 = vrot.slane %v4044_v14, %v4968_v60  ;;  %v1717_v2 = vadd.f32 %v4994_v16, %v1660_v34  ;;  %v1821_v41 = vadd.f32 %v4244_v22, %v1353_v11 }
 0x2a5   :  { %v1791_v50 = vadd.f32 %v1783_v0, %v1630_v3  ;;  %v1892_v58 = vmin.f32 %v4286_v18, %v1884_v23  ;;  %v1405_v57 = vmax.f32 %v4205_v32, %v1397_v47  ;;  %vm1455_vm8 = vcmp.eq.s32.totalorder %v1447_v17, 1 }
 0x2a6   :  { %v1564_v62 = vmax.f32 %v4252_v55, %v1556_v37  ;;  %v1725_v14 = vmax.f32 %v4260_v27, %v1717_v2  ;;  %v1878_v13 = vadd.f32 %v4995_v48, %v1821_v41  ;;  %v1930_v32 = vrot.slane %v4072_v38, %v4968_v60 }
 0x2a7   :  { %v1944_v6 = vsel %vm1936_vm7, %v1892_v58, 0.0  ;;  %v1413_v22 = vmin.f32 %v4213_v33, %v1405_v57  ;;  %vm1616_vm9 = vcmp.eq.s32.totalorder %v1608_v59, 1 }
 0x2a8   :  { %v1952_v53 = vadd.f32 %v1944_v6, %v1791_v50  ;;  %v1572_v9 = vmin.f32 %v4256_v29, %v1564_v62  ;;  %v1733_v5 = vmin.f32 %v4278_v24, %v1725_v14  ;;  %v1886_v63 = vmax.f32 %v4282_v35, %v1878_v13 }
 0x2a9   :  { %v1463_v7 = vsel %vm1455_vm8, %v1413_v22, 0.0  ;;  %vm1938_vm11 = vcmp.eq.s32.totalorder %v1930_v32, 1 }
 0x2aa   :  { %v1980_v55 = vcombine.low %v1951_v21, %v1952_v53  ;;  %v1624_v27 = vsel %vm1616_vm9, %v1572_v9, 0.0  ;;  %v1785_v31 = vsel %vm1777_vm10, %v1733_v5, 0.0  ;;  %v1894_v51 = vmin.f32 %v4286_v18, %v1886_v63 }
 0x2ab   :  { %v1632_v33 = vadd.f32 %v1624_v27, %v1463_v7 }
 0x2ac   :  { %v1946_v30 = vsel %vm1938_vm11, %v1894_v51, 0.0  ;;  %v1988_v60 = vrot.slane %v1980_v55, %v4477_v25 }
 0x2ad   :  { %v1793_v12 = vadd.f32 %v1785_v31, %v1632_v33 }
 0x2af   :  { %v1954_v38 = vadd.f32 %v1946_v30, %v1793_v12 }
 0x2b1   :  { %v1981_v29 = vcombine.low %v1953_v20, %v1954_v38 }
 0x2b3   :  { %v1995_v24 = vrot.slane %v1981_v29, %v4477_v25 }
 0x2b5   :  { %v1996_v52 = vcombine.low %v1988_v60, %v1995_v24 }
 0x2b7   :  { %2000 = vst [vmem:[%s4697_s9 + $0x8] sm:$0xff] %v1996_v52 }
 0x2b8   :  { %2005 = vsyncpa [#allocation4], 1 }
 0x2b9   :  { %2006 = vsyncpa [#allocation6], 1 }
 0x2ba   :  { %2007 = vsyncpa [#allocation9], 1 }

</bundles_post_ra>
